<compile_context>
chip_gen: v7x
topology: tpu7x:2x2x1
jax: 0.10.0
libtpu: 0.0.40
codegen_flags: <defaults>
</compile_context>

<pallas_src>
import functools

import jax
import jax.numpy as jnp
from jax.experimental import pallas as pl
from jax.experimental.pallas import tpu as pltpu


def _round_up(x, m):
    return ((x + m - 1) // m) * m


def _coattention_kernel(
    # scalar prefetch (SMEM): attention-logit biases [b_a1, b_a2, b_a3]
    b_a_ref,
    # VMEM data
    q_ref, im_ref, mask_ref,
    # VMEM packed weights
    w_q_ref, b_q_ref,        # [w_h1 | w_h3_1] : (Dq, 2E), (1, 2E)
    w_im_ref, b_im_ref,      # w_h2_1          : (Di, E), (1, E)
    w_s1_ref, b_s1_ref,      # w_h2_2          : (Dq, E), (1, E)
    w_v2_ref, b_v2_ref,      # w_h3_2          : (Di, E), (1, E)
    w_a_ref,                 # rows [w_a1; w_a2; w_a3] : (3, E)
    # outputs
    s3_ref, v2_ref,
    *, emb_dim, mxu_dtype,
):
    f32 = jnp.float32
    q = q_ref[...].astype(f32)        # (Bt, Lq, Dq)
    im = im_ref[...].astype(f32)      # (Bt, Li, Di)
    mask = mask_ref[...].astype(f32)  # (Bt, Lq)

    bt, lq, dq = q.shape
    _, li, di = im.shape
    e = emb_dim

    def mm(x, w_ref):
        # MXU matmul; operands optionally cast to bf16 (v6e/v7x), f32 accumulate.
        return jnp.dot(x.astype(mxu_dtype), w_ref[...].astype(mxu_dtype),
                       preferred_element_type=f32)

    w_a = w_a_ref[...].astype(f32)    # (3, E)

    # ---- fused q-side projection: Linear_h1 and Linear_h3_1 in one MXU pass ----
    q2d = q.reshape(bt * lq, dq)
    hq = mm(q2d, w_q_ref) + b_q_ref[...]                  # (Bt*Lq, 2E)
    h1 = jnp.tanh(hq[:, :e]).reshape(bt, lq, e)           # (Bt, Lq, E)
    h3_1 = hq[:, e:].reshape(bt, lq, e)                   # pre-tanh, used in branch 3

    # ---- branch 1: query self-attention (masked softmax, row layout) ----
    a1_log = jnp.sum(h1 * w_a[0:1, :], axis=-1) + b_a_ref[0]        # (Bt, Lq)
    a1_e = jnp.exp(a1_log - jnp.max(a1_log, axis=-1, keepdims=True)) * mask
    a1 = a1_e / jnp.sum(a1_e, axis=-1, keepdims=True)               # (Bt, Lq)
    # literal PyTorch broadcast (requires Lq == Dq): S1[b,d] = A1[b,d] * sum_l q[b,l,d]
    s1 = a1 * jnp.sum(q, axis=1)                                    # (Bt, Dq)

    # ---- branch 2: image attention guided by S1 ----
    h2_1 = mm(im.reshape(bt * li, di), w_im_ref) + b_im_ref[...]    # (Bt*Li, E)
    h2_2 = mm(s1, w_s1_ref) + b_s1_ref[...]                         # (Bt, E)
    h2 = jnp.tanh(h2_1.reshape(bt, li, e) + h2_2[:, None, :])       # (Bt, Li, E)
    a2_log = jnp.sum(h2 * w_a[1:2, :], axis=-1) + b_a_ref[1]        # (Bt, Li)
    a2_e = jnp.exp(a2_log - jnp.max(a2_log, axis=-1, keepdims=True))
    a2 = a2_e / jnp.sum(a2_e, axis=-1, keepdims=True)
    v2 = jnp.sum(a2[:, :, None] * im, axis=1)                       # (Bt, Di)

    # ---- branch 3: query attention guided by V2 ----
    h3_2 = mm(v2, w_v2_ref) + b_v2_ref[...]                         # (Bt, E)
    h3 = jnp.tanh(h3_1 + h3_2[:, None, :])                          # (Bt, Lq, E)
    a3_log = jnp.sum(h3 * w_a[2:3, :], axis=-1) + b_a_ref[2]        # (Bt, Lq)
    a3_e = jnp.exp(a3_log - jnp.max(a3_log, axis=-1, keepdims=True))
    a3 = a3_e / jnp.sum(a3_e, axis=-1, keepdims=True)
    s3 = jnp.sum(a3[:, :, None] * q, axis=1)                        # (Bt, Dq)

    s3_ref[...] = s3.astype(s3_ref.dtype)
    v2_ref[...] = v2.astype(v2_ref.dtype)


def _pack_params(p):
    """Fuse/concatenate the 16 PyTorch tensors into 9 TPU-friendly arrays."""
    return dict(
        w_q=jnp.concatenate([p["w_h1"], p["w_h3_1"]], axis=1),     # (Dq, 2E)
        b_q=jnp.concatenate([p["b_h1"], p["b_h3_1"]], axis=1),     # (1, 2E)
        w_im=p["w_h2_1"], b_im=p["b_h2_1"],
        w_s1=p["w_h2_2"], b_s1=p["b_h2_2"],
        w_v2=p["w_h3_2"], b_v2=p["b_h3_2"],
        w_a=jnp.concatenate([p["w_a1"].T, p["w_a2"].T, p["w_a3"].T], axis=0),  # (3, E)
        b_a=jnp.concatenate([p["b_a1"].reshape(-1), p["b_a2"].reshape(-1),
                             p["b_a3"].reshape(-1)]),               # (3,)
    )


def alternative_coattention(query_feature, img_feature, mask, params,
                            *, batch_tile=64, mxu_dtype=jnp.float32):
    B, Lq, Dq = query_feature.shape
    _, Li, Di = img_feature.shape
    assert Lq == Dq, "module ties query_seq_len = query_input_dim"
    E = params["w_h1"].shape[1]

    packed = _pack_params(params)

    # Batch tile: multiple of 8 so mask / output blocks are sublane-aligned.
    # Prefer >= 2 grid steps when the batch allows it (v7x has 2 TensorCores).
    # Keep per-step working set modest (v7x scoped VMEM is half of v5e/v6e).
    b8 = _round_up(B, 8)
    bt = min(_round_up(max(batch_tile, 1), 8), b8)
    if b8 >= 16 and b8 // bt < 2:
        bt = _round_up(pl.cdiv(b8, 2), 8)
    b_pad = _round_up(B, bt)
    grid = b_pad // bt

    mask = mask.astype(jnp.float32)
    if b_pad != B:
        pad = b_pad - B
        query_feature = jnp.pad(query_feature, ((0, pad), (0, 0), (0, 0)))
        img_feature = jnp.pad(img_feature, ((0, pad), (0, 0), (0, 0)))
        # pad mask with ones so padded rows don't produce 0/0 (outputs are sliced off)
        mask = jnp.pad(mask, ((0, pad), (0, 0)), constant_values=1.0)

    weights = [packed["w_q"], packed["b_q"], packed["w_im"], packed["b_im"],
               packed["w_s1"], packed["b_s1"], packed["w_v2"], packed["b_v2"],
               packed["w_a"]]

    data_specs = [
        pl.BlockSpec((bt, Lq, Dq), lambda b, ba: (b, 0, 0)),
        pl.BlockSpec((bt, Li, Di), lambda b, ba: (b, 0, 0)),
        pl.BlockSpec((bt, Lq), lambda b, ba: (b, 0)),
    ]
    weight_specs = [pl.BlockSpec(w.shape, lambda b, ba: (0, 0)) for w in weights]

    out_shapes = (
        jax.ShapeDtypeStruct((b_pad, Dq), jnp.float32),
        jax.ShapeDtypeStruct((b_pad, Di), jnp.float32),
    )
    out_specs = [
        pl.BlockSpec((bt, Dq), lambda b, ba: (b, 0)),
        pl.BlockSpec((bt, Di), lambda b, ba: (b, 0)),
    ]

    grid_spec = pltpu.PrefetchScalarGridSpec(
        num_scalar_prefetch=1,               # b_a -> SMEM
        grid=(grid,),
        in_specs=data_specs + weight_specs,
        out_specs=out_specs,
    )

    kernel = functools.partial(_coattention_kernel, emb_dim=E, mxu_dtype=mxu_dtype)

    s3, v2 = pl.pallas_call(
        kernel,
        out_shape=out_shapes,
        grid_spec=grid_spec,
        compiler_params=pltpu.CompilerParams(
            dimension_semantics=("parallel",),
        ),
    )(packed["b_a"], query_feature, img_feature, mask, *weights)

    return s3[:B], v2[:B]


def init_params(key, Dq, Di, E):
    """PyTorch nn.Linear-style init; weights stored as (in, out) for x @ W."""
    def linear(k, fan_in, fan_out):
        k1, k2 = jax.random.split(k)
        bound = 1.0 / float(fan_in) ** 0.5
        w = jax.random.uniform(k1, (fan_in, fan_out), jnp.float32, -bound, bound)
        b = jax.random.uniform(k2, (1, fan_out), jnp.float32, -bound, bound)
        return w, b

    keys = jax.random.split(key, 8)
    p = {}
    p["w_h1"], p["b_h1"] = linear(keys[0], Dq, E)
    p["w_a1"], p["b_a1"] = linear(keys[1], E, 1)
    p["w_h2_1"], p["b_h2_1"] = linear(keys[2], Di, E)
    p["w_h2_2"], p["b_h2_2"] = linear(keys[3], Dq, E)
    p["w_a2"], p["b_a2"] = linear(keys[4], E, 1)
    p["w_h3_1"], p["b_h3_1"] = linear(keys[5], Dq, E)
    p["w_h3_2"], p["b_h3_2"] = linear(keys[6], Di, E)
    p["w_a3"], p["b_a3"] = linear(keys[7], E, 1)
    return p


def reference(q, im, mask, p):
    """Plain-JAX mirror of the (eval-mode) PyTorch forward for verification."""
    h1 = jnp.tanh(q @ p["w_h1"] + p["b_h1"])
    a1 = (h1 @ p["w_a1"] + p["b_a1"])[..., 0]                      # (B, Lq)
    e1 = jnp.exp(a1 - jnp.max(a1, axis=1, keepdims=True)) * mask
    a1 = e1 / jnp.sum(e1, axis=1, keepdims=True)
    s1 = jnp.sum(a1[:, None, :] * q, axis=1)                       # literal broadcast, (B, Dq)

    h2 = jnp.tanh(im @ p["w_h2_1"] + p["b_h2_1"]
                  + (s1 @ p["w_h2_2"] + p["b_h2_2"])[:, None, :])
    a2 = jax.nn.softmax((h2 @ p["w_a2"] + p["b_a2"])[..., 0], axis=1)
    v2 = jnp.sum(a2[..., None] * im, axis=1)

    h3 = jnp.tanh(q @ p["w_h3_1"] + p["b_h3_1"]
                  + (v2 @ p["w_h3_2"] + p["b_h3_2"])[:, None, :])
    a3 = jax.nn.softmax((h3 @ p["w_a3"] + p["b_a3"])[..., 0], axis=1)
    s3 = jnp.sum(a3[..., None] * q, axis=1)
    return s3, v2


if __name__ == "__main__":
    B = 2
    Lq = Dq = 16          # module requires query_seq_len == query_input_dim
    Li, Di = 8, 16
    E = 32

    key = jax.random.PRNGKey(0)
    kq, ki, kp = jax.random.split(key, 3)
    query_feature = jax.random.normal(kq, (B, Lq, Dq), jnp.float32)
    img_feature = jax.random.normal(ki, (B, Li, Di), jnp.float32)
    mask = jnp.concatenate(
        [jnp.ones((B, Lq - 4), jnp.float32), jnp.zeros((B, 4), jnp.float32)], axis=1
    )
    params = init_params(kp, Dq, Di, E)

    # Default mxu_dtype=float32 for exact parity; pass jnp.bfloat16 on v6e/v7x
    # for ~2x faster MXU passes (f32 accumulation, looser tolerance required).
    s3, v2 = alternative_coattention(query_feature, img_feature, mask, params)
    jax.block_until_ready((s3, v2))

    s3_ref, v2_ref = reference(query_feature, img_feature, mask, params)
    assert jnp.allclose(s3, s3_ref, rtol=1e-4, atol=1e-4), "S3 mismatch"
    assert jnp.allclose(v2, v2_ref, rtol=1e-4, atol=1e-4), "V2 mismatch"
    print("KERNEL_OK")
</pallas_src>

<mosaic_0001>
module attributes {stable_mosaic.version = 11 : i64} {
  func.func @_coattention_kernel(%arg0: i32, %arg1: memref<3xf32, #tpu.memory_space<smem>>, %arg2: memref<8x16x16xf32, #tpu.memory_space<vmem>>, %arg3: memref<8x8x16xf32, #tpu.memory_space<vmem>>, %arg4: memref<8x16xf32, #tpu.memory_space<vmem>>, %arg5: memref<16x64xf32, #tpu.memory_space<vmem>>, %arg6: memref<1x64xf32, #tpu.memory_space<vmem>>, %arg7: memref<16x32xf32, #tpu.memory_space<vmem>>, %arg8: memref<1x32xf32, #tpu.memory_space<vmem>>, %arg9: memref<16x32xf32, #tpu.memory_space<vmem>>, %arg10: memref<1x32xf32, #tpu.memory_space<vmem>>, %arg11: memref<16x32xf32, #tpu.memory_space<vmem>>, %arg12: memref<1x32xf32, #tpu.memory_space<vmem>>, %arg13: memref<3x32xf32, #tpu.memory_space<vmem>>, %arg14: memref<8x16xf32, #tpu.memory_space<vmem>>, %arg15: memref<8x16xf32, #tpu.memory_space<vmem>>) attributes {dimension_semantics = [#tpu.dimension_semantics<parallel>], iteration_bounds = array<i64: 1>, scalar_prefetch = 1 : i64, scratch_operands = 0 : i64, tpu.core_type = #tpu.core_type<tc>, window_params = [{transform_indices = @transform_0, window_bounds = array<i64: 8, 16, 16>}, {transform_indices = @transform_1, window_bounds = array<i64: 8, 8, 16>}, {transform_indices = @transform_2, window_bounds = array<i64: 8, 16>}, {pipeline_mode = #tpu.pipeline_mode<synchronous>, transform_indices = @transform_3, window_bounds = array<i64: 16, 64>}, {pipeline_mode = #tpu.pipeline_mode<synchronous>, transform_indices = @transform_4, window_bounds = array<i64: 1, 64>}, {pipeline_mode = #tpu.pipeline_mode<synchronous>, transform_indices = @transform_5, window_bounds = array<i64: 16, 32>}, {pipeline_mode = #tpu.pipeline_mode<synchronous>, transform_indices = @transform_6, window_bounds = array<i64: 1, 32>}, {pipeline_mode = #tpu.pipeline_mode<synchronous>, transform_indices = @transform_7, window_bounds = array<i64: 16, 32>}, {pipeline_mode = #tpu.pipeline_mode<synchronous>, transform_indices = @transform_8, window_bounds = array<i64: 1, 32>}, {pipeline_mode = #tpu.pipeline_mode<synchronous>, transform_indices = @transform_9, window_bounds = array<i64: 16, 32>}, {pipeline_mode = #tpu.pipeline_mode<synchronous>, transform_indices = @transform_10, window_bounds = array<i64: 1, 32>}, {pipeline_mode = #tpu.pipeline_mode<synchronous>, transform_indices = @transform_11, window_bounds = array<i64: 3, 32>}, {transform_indices = @transform_12, window_bounds = array<i64: 8, 16>}, {transform_indices = @transform_13, window_bounds = array<i64: 8, 16>}]} {
    %c0 = arith.constant 0 : index
    %c0_0 = arith.constant 0 : index
    %c0_1 = arith.constant 0 : index
    %0 = vector.load %arg2[%c0, %c0_0, %c0_1] : memref<8x16x16xf32, #tpu.memory_space<vmem>>, vector<8x16x16xf32>
    %c0_2 = arith.constant 0 : index
    %c0_3 = arith.constant 0 : index
    %c0_4 = arith.constant 0 : index
    %1 = vector.load %arg3[%c0_2, %c0_3, %c0_4] : memref<8x8x16xf32, #tpu.memory_space<vmem>>, vector<8x8x16xf32>
    %c0_5 = arith.constant 0 : index
    %c0_6 = arith.constant 0 : index
    %2 = vector.load %arg4[%c0_5, %c0_6] : memref<8x16xf32, #tpu.memory_space<vmem>>, vector<8x16xf32>
    %c0_7 = arith.constant 0 : index
    %c0_8 = arith.constant 0 : index
    %3 = vector.load %arg13[%c0_7, %c0_8] : memref<3x32xf32, #tpu.memory_space<vmem>>, vector<3x32xf32>
    %4 = vector.shape_cast %0 : vector<8x16x16xf32> to vector<128x16xf32>
    %c0_9 = arith.constant 0 : index
    %c0_10 = arith.constant 0 : index
    %5 = vector.load %arg5[%c0_9, %c0_10] : memref<16x64xf32, #tpu.memory_space<vmem>>, vector<16x64xf32>
    %cst = arith.constant dense<0.000000e+00> : vector<128x64xf32>
    %6 = tpu.matmul %4, %5, %cst {dimension_numbers = #tpu.dot_dimension_numbers<[1], [0], [0], [1], [0, 0, 1, 1], [], []>} : vector<128x16xf32>, vector<16x64xf32>, vector<128x64xf32> -> vector<128x64xf32>
    %c0_11 = arith.constant 0 : index
    %c0_12 = arith.constant 0 : index
    %7 = vector.load %arg6[%c0_11, %c0_12] : memref<1x64xf32, #tpu.memory_space<vmem>>, vector<1x64xf32>
    %8 = vector.broadcast %7 : vector<1x64xf32> to vector<128x64xf32>
    %9 = arith.addf %6, %8 : vector<128x64xf32>
    %10 = vector.extract_strided_slice %9 {offsets = [0, 0], sizes = [128, 32], strides = [1, 1]} : vector<128x64xf32> to vector<128x32xf32>
    %11 = math.tanh %10 : vector<128x32xf32>
    %12 = vector.shape_cast %11 : vector<128x32xf32> to vector<8x16x32xf32>
    %13 = vector.extract_strided_slice %9 {offsets = [0, 32], sizes = [128, 32], strides = [1, 1]} : vector<128x64xf32> to vector<128x32xf32>
    %14 = vector.shape_cast %13 : vector<128x32xf32> to vector<8x16x32xf32>
    %15 = vector.extract_strided_slice %3 {offsets = [0, 0], sizes = [1, 32], strides = [1, 1]} : vector<3x32xf32> to vector<1x32xf32>
    %16 = vector.shape_cast %15 : vector<1x32xf32> to vector<1x1x32xf32>
    %17 = vector.broadcast %16 : vector<1x1x32xf32> to vector<8x16x32xf32>
    %18 = arith.mulf %12, %17 : vector<8x16x32xf32>
    %cst_13 = arith.constant dense<0.000000e+00> : vector<8x16xf32>
    %19 = vector.multi_reduction <add>, %18, %cst_13 [2] : vector<8x16x32xf32> to vector<8x16xf32>
    %c0_14 = arith.constant 0 : index
    %20 = memref.load %arg1[%c0_14] : memref<3xf32, #tpu.memory_space<smem>>
    %21 = vector.broadcast %20 : f32 to vector<8x16xf32>
    %22 = arith.addf %19, %21 : vector<8x16xf32>
    %cst_15 = arith.constant dense<0xFF800000> : vector<8xf32>
    %23 = vector.multi_reduction <maximumf>, %22, %cst_15 [1] : vector<8x16xf32> to vector<8xf32>
    %24 = vector.shape_cast %23 : vector<8xf32> to vector<8x1xf32>
    %25 = vector.broadcast %24 : vector<8x1xf32> to vector<8x16xf32>
    %26 = arith.subf %22, %25 : vector<8x16xf32>
    %27 = math.exp %26 : vector<8x16xf32>
    %28 = arith.mulf %27, %2 : vector<8x16xf32>
    %cst_16 = arith.constant dense<0.000000e+00> : vector<8xf32>
    %29 = vector.multi_reduction <add>, %28, %cst_16 [1] : vector<8x16xf32> to vector<8xf32>
    %30 = vector.shape_cast %29 : vector<8xf32> to vector<8x1xf32>
    %31 = vector.broadcast %30 : vector<8x1xf32> to vector<8x16xf32>
    %32 = arith.divf %28, %31 : vector<8x16xf32>
    %cst_17 = arith.constant dense<0.000000e+00> : vector<8x16xf32>
    %33 = vector.multi_reduction <add>, %0, %cst_17 [1] : vector<8x16x16xf32> to vector<8x16xf32>
    %34 = arith.mulf %32, %33 : vector<8x16xf32>
    %35 = vector.shape_cast %1 : vector<8x8x16xf32> to vector<64x16xf32>
    %c0_18 = arith.constant 0 : index
    %c0_19 = arith.constant 0 : index
    %36 = vector.load %arg7[%c0_18, %c0_19] : memref<16x32xf32, #tpu.memory_space<vmem>>, vector<16x32xf32>
    %cst_20 = arith.constant dense<0.000000e+00> : vector<64x32xf32>
    %37 = tpu.matmul %35, %36, %cst_20 {dimension_numbers = #tpu.dot_dimension_numbers<[1], [0], [0], [1], [0, 0, 1, 1], [], []>} : vector<64x16xf32>, vector<16x32xf32>, vector<64x32xf32> -> vector<64x32xf32>
    %c0_21 = arith.constant 0 : index
    %c0_22 = arith.constant 0 : index
    %38 = vector.load %arg8[%c0_21, %c0_22] : memref<1x32xf32, #tpu.memory_space<vmem>>, vector<1x32xf32>
    %39 = vector.broadcast %38 : vector<1x32xf32> to vector<64x32xf32>
    %40 = arith.addf %37, %39 : vector<64x32xf32>
    %c0_23 = arith.constant 0 : index
    %c0_24 = arith.constant 0 : index
    %41 = vector.load %arg9[%c0_23, %c0_24] : memref<16x32xf32, #tpu.memory_space<vmem>>, vector<16x32xf32>
    %cst_25 = arith.constant dense<0.000000e+00> : vector<8x32xf32>
    %42 = tpu.matmul %34, %41, %cst_25 {dimension_numbers = #tpu.dot_dimension_numbers<[1], [0], [0], [1], [0, 0, 1, 1], [], []>} : vector<8x16xf32>, vector<16x32xf32>, vector<8x32xf32> -> vector<8x32xf32>
    %c0_26 = arith.constant 0 : index
    %c0_27 = arith.constant 0 : index
    %43 = vector.load %arg10[%c0_26, %c0_27] : memref<1x32xf32, #tpu.memory_space<vmem>>, vector<1x32xf32>
    %44 = vector.broadcast %43 : vector<1x32xf32> to vector<8x32xf32>
    %45 = arith.addf %42, %44 : vector<8x32xf32>
    %46 = vector.shape_cast %40 : vector<64x32xf32> to vector<8x8x32xf32>
    %47 = vector.shape_cast %45 : vector<8x32xf32> to vector<8x1x32xf32>
    %48 = vector.broadcast %47 : vector<8x1x32xf32> to vector<8x8x32xf32>
    %49 = arith.addf %46, %48 : vector<8x8x32xf32>
    %50 = math.tanh %49 : vector<8x8x32xf32>
    %51 = vector.extract_strided_slice %3 {offsets = [1, 0], sizes = [1, 32], strides = [1, 1]} : vector<3x32xf32> to vector<1x32xf32>
    %52 = vector.shape_cast %51 : vector<1x32xf32> to vector<1x1x32xf32>
    %53 = vector.broadcast %52 : vector<1x1x32xf32> to vector<8x8x32xf32>
    %54 = arith.mulf %50, %53 : vector<8x8x32xf32>
    %cst_28 = arith.constant dense<0.000000e+00> : vector<8x8xf32>
    %55 = vector.multi_reduction <add>, %54, %cst_28 [2] : vector<8x8x32xf32> to vector<8x8xf32>
    %c1 = arith.constant 1 : index
    %56 = memref.load %arg1[%c1] : memref<3xf32, #tpu.memory_space<smem>>
    %57 = vector.broadcast %56 : f32 to vector<8x8xf32>
    %58 = arith.addf %55, %57 : vector<8x8xf32>
    %cst_29 = arith.constant dense<0xFF800000> : vector<8xf32>
    %59 = vector.multi_reduction <maximumf>, %58, %cst_29 [1] : vector<8x8xf32> to vector<8xf32>
    %60 = vector.shape_cast %59 : vector<8xf32> to vector<8x1xf32>
    %61 = vector.broadcast %60 : vector<8x1xf32> to vector<8x8xf32>
    %62 = arith.subf %58, %61 : vector<8x8xf32>
    %63 = math.exp %62 : vector<8x8xf32>
    %cst_30 = arith.constant dense<0.000000e+00> : vector<8xf32>
    %64 = vector.multi_reduction <add>, %63, %cst_30 [1] : vector<8x8xf32> to vector<8xf32>
    %65 = vector.shape_cast %64 : vector<8xf32> to vector<8x1xf32>
    %66 = vector.broadcast %65 : vector<8x1xf32> to vector<8x8xf32>
    %67 = arith.divf %63, %66 : vector<8x8xf32>
    %68 = vector.shape_cast %67 : vector<8x8xf32> to vector<8x8x1xf32>
    %69 = vector.broadcast %68 : vector<8x8x1xf32> to vector<8x8x16xf32>
    %70 = arith.mulf %69, %1 : vector<8x8x16xf32>
    %cst_31 = arith.constant dense<0.000000e+00> : vector<8x16xf32>
    %71 = vector.multi_reduction <add>, %70, %cst_31 [1] : vector<8x8x16xf32> to vector<8x16xf32>
    %c0_32 = arith.constant 0 : index
    %c0_33 = arith.constant 0 : index
    %72 = vector.load %arg11[%c0_32, %c0_33] : memref<16x32xf32, #tpu.memory_space<vmem>>, vector<16x32xf32>
    %cst_34 = arith.constant dense<0.000000e+00> : vector<8x32xf32>
    %73 = tpu.matmul %71, %72, %cst_34 {dimension_numbers = #tpu.dot_dimension_numbers<[1], [0], [0], [1], [0, 0, 1, 1], [], []>} : vector<8x16xf32>, vector<16x32xf32>, vector<8x32xf32> -> vector<8x32xf32>
    %c0_35 = arith.constant 0 : index
    %c0_36 = arith.constant 0 : index
    %74 = vector.load %arg12[%c0_35, %c0_36] : memref<1x32xf32, #tpu.memory_space<vmem>>, vector<1x32xf32>
    %75 = vector.broadcast %74 : vector<1x32xf32> to vector<8x32xf32>
    %76 = arith.addf %73, %75 : vector<8x32xf32>
    %77 = vector.shape_cast %76 : vector<8x32xf32> to vector<8x1x32xf32>
    %78 = vector.broadcast %77 : vector<8x1x32xf32> to vector<8x16x32xf32>
    %79 = arith.addf %14, %78 : vector<8x16x32xf32>
    %80 = math.tanh %79 : vector<8x16x32xf32>
    %81 = vector.extract_strided_slice %3 {offsets = [2, 0], sizes = [1, 32], strides = [1, 1]} : vector<3x32xf32> to vector<1x32xf32>
    %82 = vector.shape_cast %81 : vector<1x32xf32> to vector<1x1x32xf32>
    %83 = vector.broadcast %82 : vector<1x1x32xf32> to vector<8x16x32xf32>
    %84 = arith.mulf %80, %83 : vector<8x16x32xf32>
    %cst_37 = arith.constant dense<0.000000e+00> : vector<8x16xf32>
    %85 = vector.multi_reduction <add>, %84, %cst_37 [2] : vector<8x16x32xf32> to vector<8x16xf32>
    %c2 = arith.constant 2 : index
    %86 = memref.load %arg1[%c2] : memref<3xf32, #tpu.memory_space<smem>>
    %87 = vector.broadcast %86 : f32 to vector<8x16xf32>
    %88 = arith.addf %85, %87 : vector<8x16xf32>
    %cst_38 = arith.constant dense<0xFF800000> : vector<8xf32>
    %89 = vector.multi_reduction <maximumf>, %88, %cst_38 [1] : vector<8x16xf32> to vector<8xf32>
    %90 = vector.shape_cast %89 : vector<8xf32> to vector<8x1xf32>
    %91 = vector.broadcast %90 : vector<8x1xf32> to vector<8x16xf32>
    %92 = arith.subf %88, %91 : vector<8x16xf32>
    %93 = math.exp %92 : vector<8x16xf32>
    %cst_39 = arith.constant dense<0.000000e+00> : vector<8xf32>
    %94 = vector.multi_reduction <add>, %93, %cst_39 [1] : vector<8x16xf32> to vector<8xf32>
    %95 = vector.shape_cast %94 : vector<8xf32> to vector<8x1xf32>
    %96 = vector.broadcast %95 : vector<8x1xf32> to vector<8x16xf32>
    %97 = arith.divf %93, %96 : vector<8x16xf32>
    %98 = vector.shape_cast %97 : vector<8x16xf32> to vector<8x16x1xf32>
    %99 = vector.broadcast %98 : vector<8x16x1xf32> to vector<8x16x16xf32>
    %100 = arith.mulf %99, %0 : vector<8x16x16xf32>
    %cst_40 = arith.constant dense<0.000000e+00> : vector<8x16xf32>
    %101 = vector.multi_reduction <add>, %100, %cst_40 [1] : vector<8x16x16xf32> to vector<8x16xf32>
    %c0_41 = arith.constant 0 : index
    %c0_42 = arith.constant 0 : index
    %102 = vector.load %arg14[%c0_41, %c0_42] : memref<8x16xf32, #tpu.memory_space<vmem>>, vector<8x16xf32>
    tpu.vector_store %arg14[%c0_41, %c0_42], %101 {strides = array<i32>} : memref<8x16xf32, #tpu.memory_space<vmem>>, vector<8x16xf32>,
    %c0_43 = arith.constant 0 : index
    %c0_44 = arith.constant 0 : index
    %103 = vector.load %arg15[%c0_43, %c0_44] : memref<8x16xf32, #tpu.memory_space<vmem>>, vector<8x16xf32>
    tpu.vector_store %arg15[%c0_43, %c0_44], %71 {strides = array<i32>} : memref<8x16xf32, #tpu.memory_space<vmem>>, vector<8x16xf32>,
    return
  }
  func.func @transform_0(%arg0: i32, %arg1: memref<3xf32, #tpu.memory_space<smem>>) -> (i32, i32, i32) {
    %c0_i32 = arith.constant 0 : i32
    %c0_i32_0 = arith.constant 0 : i32
    %c0_i32_1 = arith.constant 0 : i32
    return %arg0, %c0_i32, %c0_i32_0 : i32, i32, i32
  }
  func.func @transform_1(%arg0: i32, %arg1: memref<3xf32, #tpu.memory_space<smem>>) -> (i32, i32, i32) {
    %c0_i32 = arith.constant 0 : i32
    %c0_i32_0 = arith.constant 0 : i32
    %c0_i32_1 = arith.constant 0 : i32
    return %arg0, %c0_i32, %c0_i32_0 : i32, i32, i32
  }
  func.func @transform_2(%arg0: i32, %arg1: memref<3xf32, #tpu.memory_space<smem>>) -> (i32, i32) {
    %c0_i32 = arith.constant 0 : i32
    %c0_i32_0 = arith.constant 0 : i32
    return %arg0, %c0_i32 : i32, i32
  }
  func.func @transform_3(%arg0: i32, %arg1: memref<3xf32, #tpu.memory_space<smem>>) -> (i32, i32) {
    %c0_i32 = arith.constant 0 : i32
    %c0_i32_0 = arith.constant 0 : i32
    %c0_i32_1 = arith.constant 0 : i32
    return %c0_i32, %c0_i32_0 : i32, i32
  }
  func.func @transform_4(%arg0: i32, %arg1: memref<3xf32, #tpu.memory_space<smem>>) -> (i32, i32) {
    %c0_i32 = arith.constant 0 : i32
    %c0_i32_0 = arith.constant 0 : i32
    %c0_i32_1 = arith.constant 0 : i32
    return %c0_i32, %c0_i32_0 : i32, i32
  }
  func.func @transform_5(%arg0: i32, %arg1: memref<3xf32, #tpu.memory_space<smem>>) -> (i32, i32) {
    %c0_i32 = arith.constant 0 : i32
    %c0_i32_0 = arith.constant 0 : i32
    %c0_i32_1 = arith.constant 0 : i32
    return %c0_i32, %c0_i32_0 : i32, i32
  }
  func.func @transform_6(%arg0: i32, %arg1: memref<3xf32, #tpu.memory_space<smem>>) -> (i32, i32) {
    %c0_i32 = arith.constant 0 : i32
    %c0_i32_0 = arith.constant 0 : i32
    %c0_i32_1 = arith.constant 0 : i32
    return %c0_i32, %c0_i32_0 : i32, i32
  }
  func.func @transform_7(%arg0: i32, %arg1: memref<3xf32, #tpu.memory_space<smem>>) -> (i32, i32) {
    %c0_i32 = arith.constant 0 : i32
    %c0_i32_0 = arith.constant 0 : i32
    %c0_i32_1 = arith.constant 0 : i32
    return %c0_i32, %c0_i32_0 : i32, i32
  }
  func.func @transform_8(%arg0: i32, %arg1: memref<3xf32, #tpu.memory_space<smem>>) -> (i32, i32) {
    %c0_i32 = arith.constant 0 : i32
    %c0_i32_0 = arith.constant 0 : i32
    %c0_i32_1 = arith.constant 0 : i32
    return %c0_i32, %c0_i32_0 : i32, i32
  }
  func.func @transform_9(%arg0: i32, %arg1: memref<3xf32, #tpu.memory_space<smem>>) -> (i32, i32) {
    %c0_i32 = arith.constant 0 : i32
    %c0_i32_0 = arith.constant 0 : i32
    %c0_i32_1 = arith.constant 0 : i32
    return %c0_i32, %c0_i32_0 : i32, i32
  }
  func.func @transform_10(%arg0: i32, %arg1: memref<3xf32, #tpu.memory_space<smem>>) -> (i32, i32) {
    %c0_i32 = arith.constant 0 : i32
    %c0_i32_0 = arith.constant 0 : i32
    %c0_i32_1 = arith.constant 0 : i32
    return %c0_i32, %c0_i32_0 : i32, i32
  }
  func.func @transform_11(%arg0: i32, %arg1: memref<3xf32, #tpu.memory_space<smem>>) -> (i32, i32) {
    %c0_i32 = arith.constant 0 : i32
    %c0_i32_0 = arith.constant 0 : i32
    %c0_i32_1 = arith.constant 0 : i32
    return %c0_i32, %c0_i32_0 : i32, i32
  }
  func.func @transform_12(%arg0: i32, %arg1: memref<3xf32, #tpu.memory_space<smem>>) -> (i32, i32) {
    %c0_i32 = arith.constant 0 : i32
    %c0_i32_0 = arith.constant 0 : i32
    return %arg0, %c0_i32 : i32, i32
  }
  func.func @transform_13(%arg0: i32, %arg1: memref<3xf32, #tpu.memory_space<smem>>) -> (i32, i32) {
    %c0_i32 = arith.constant 0 : i32
    %c0_i32_0 = arith.constant 0 : i32
    return %arg0, %c0_i32 : i32, i32
  }
}

</mosaic_0001>

<bundles_post_ra>
// kernel: tpu_custom_call.1
= control target key start
LH: loop header
LB: loop body
LE: loop exit
PB: predicated region body
PF: predicated region fallthrough
CT: control target
= control target key end

     0   :  { %s4886_s0 = inlined_call_operand.hbm [shape: f32[3], index: 0, kind: input, shape index: {}]   ;;  %s4887_s1 = inlined_call_operand.hbm [shape: f32[8,16,16], index: 1, kind: input, shape index: {}]   ;;  %s4888_s2 = inlined_call_operand.hbm [shape: f32[8,8,16], index: 2, kind: input, shape index: {}]   ;;  %s4889_s3 = inlined_call_operand.hbm [shape: f32[8,16], index: 3, kind: input, shape index: {}]   ;;  %s4890_s4 = inlined_call_operand.hbm [shape: f32[16,64], index: 4, kind: input, shape index: {}]   ;;  %s4891_s5 = inlined_call_operand.vmem [shape: f32[1,64], index: 5, kind: input, shape index: {}]   ;;  %s4892_s6 = inlined_call_operand.vmem [shape: f32[16,32], index: 6, kind: input, shape index: {}]   ;;  %s4893_s7 = inlined_call_operand.hbm [shape: f32[1,32], index: 7, kind: input, shape index: {}]   ;;  %s4894_s8 = inlined_call_operand.hbm [shape: f32[16,32], index: 8, kind: input, shape index: {}]   ;;  %s4895_s9 = inlined_call_operand.hbm [shape: f32[1,32], index: 9, kind: input, shape index: {}]   ;;  %s4896_s10 = inlined_call_operand.vmem [shape: f32[16,32], index: 10, kind: input, shape index: {}]   ;;  %s4897_s11 = inlined_call_operand.vmem [shape: f32[1,32], index: 11, kind: input, shape index: {}]   ;;  %s4898_s12 = inlined_call_operand.vmem [shape: f32[3,32], index: 12, kind: input, shape index: {}]   ;;  %s4899_s13 = inlined_call_operand.hbm [shape: f32[8,16], index: 13, kind: output, shape index: {0}]   ;;  %s4900_s14 = inlined_call_operand.hbm [shape: f32[8,16], index: 14, kind: output, shape index: {1}]  }
   0x1   :  { %s3431_s15 = scalar_lea.hbm %s4886_s0, 16 }
   0x2   :  { %p3432_p0 = scmp.ne.s32.totalorder %s4886_s0, %s3431_s15  ;;  %p3435_p1 = scmp.lt.u32.totalorder %s3431_s15, %s4886_s0 }
   0x4   :  { %p3437_p2 = pnand %p3435_p1, %p3432_p0 }
   0x6   :  { %3440 = shalt.err (!%p3437_p2)  }
   0x7   :  { %s3653_s20 = smov [#allocation3]  }
   0x8   :  { %21 = dma.hbm_to_smem %s4886_s0, 16, %s3653_s20, [#allocation2] }
   0x9   :  { %3639 = dma.done.wait [#allocation2], 16 }
   0xa   :  { %3640 = vsyncadd [#allocation2], 4294967280 }
   0xb   :  { %23 = sfence }
   0xc   :  { %24 = vsyncpa [#allocation5], 0 }
   0xd   :  { %25 = vsyncpa [#allocation8], 0 }
   0xe   :  { %26 = vsyncpa [#allocation11], 0 }
   0xf   :  { %27 = vsyncpa [#allocation14], 0 }
  0x10   :  { %28 = vsyncpa [#allocation6], 0 }
  0x11   :  { %29 = vsyncpa [#allocation18], 0  ;;  %s3654_s23 = smov [#allocation7]   ;;  %s3655_s25 = smov [#allocation10]  }
  0x12   :  { %s47_s24 = sshll.u32 %s3654_s23, 4  ;;  %s69_s26 = sshll.u32 %s3655_s25, 4  ;;  %s48_s24 = int_to_ptr.vmem [resolvable:$true] %s47_s24  ;;  %s3759_s26 = int_to_ptr.vmem [resolvable:$true] %s69_s26 }
  0x13   :  { %s3441_s0 = scalar_lea.hbm %s4888_s2, 1024 }
  0x14   :  { %p3442_p3 = scmp.ne.s32.totalorder %s4888_s2, %s3441_s0  ;;  %p3445_p4 = scmp.lt.u32.totalorder %s3441_s0, %s4888_s2 }
  0x16   :  { %p3447_p5 = pnand %p3445_p4, %p3442_p3 }
  0x18   :  { %3450 = shalt.err (!%p3447_p5)
}
  0x19   :  { %s3451_s17 = scalar_lea.vmem %s48_s24, 1024  ;;  %p3456_p7 = scmp.lt.s32.totalorder %s48_s24, %s48_s24 }
  0x1a   :  { %p3452_p6 = scmp.ne.s32.totalorder %s48_s24, %s3451_s17  ;;  %p3457_p8 = scmp.lt.s32.totalorder %s3451_s17, %s3451_s17 }
  0x1c   :  { %p3458_p9 = por %p3457_p8, %p3456_p7 }
  0x1e   :  { %p3459_p10 = pnand %p3458_p9, %p3452_p6 }
  0x20   :  { %3462 = shalt.err (!%p3459_p10)
}
  0x21   :  { %s3656_s18 = smov 128   ;;  %s3657_s19 = smov 8  }
  0x22   :  { %53 = dma.hbm_to_vmem [thread:$0]  %s4888_s2, 1024, %s48_s24, [#allocation8], %s3656_s18, %s3656_s18, %s3657_s19  }
  0x23   :  { %s3463_s25 = scalar_lea.hbm %s4890_s4, 256 }
  0x24   :  { %p3464_p11 = scmp.ne.s32.totalorder %s4890_s4, %s3463_s25  ;;  %p3467_p12 = scmp.lt.u32.totalorder %s3463_s25, %s4890_s4 }
  0x26   :  { %p3469_p13 = pnand %p3467_p12, %p3464_p11 }
  0x28   :  { %3472 = shalt.err (!%p3469_p13)
}
  0x29   :  { %s3473_s30 = scalar_lea.vmem %s3759_s26, 256  ;;  %p3478_p1 = scmp.lt.s32.totalorder %s3759_s26, %s3759_s26 }
  0x2a   :  { %p3474_p0 = scmp.ne.s32.totalorder %s3759_s26, %s3473_s30  ;;  %p3479_p2 = scmp.lt.s32.totalorder %s3473_s30, %s3473_s30 }
  0x2c   :  { %p3480_p3 = por %p3479_p2, %p3478_p1 }
  0x2e   :  { %p3481_p4 = pnand %p3480_p3, %p3474_p0 }
  0x30   :  { %3484 = shalt.err (!%p3481_p4)
}
  0x31   :  { %75 = dma.hbm_to_vmem [thread:$0]  %s4890_s4, 256, %s3759_s26, [#allocation11], %s3656_s18, %s3656_s18, %s3657_s19  }
  0x32   :  { %s3658_s15 = smov [#allocation13]   ;;  %s3659_s17 = smov [#allocation4]  }
  0x33   :  { %s95_s16 = sshll.u32 %s3658_s15, 4  ;;  %s35_s20 = sshll.u32 %s3659_s17, 4  ;;  %s96_s16 = int_to_ptr.vmem [resolvable:$true] %s95_s16  ;;  %s3796_s20 = int_to_ptr.vmem [resolvable:$true] %s35_s20 }
  0x34   :  { %s3485_s23 = scalar_lea.hbm %s4894_s8, 256 }
  0x35   :  { %p3486_p5 = scmp.ne.s32.totalorder %s4894_s8, %s3485_s23  ;;  %p3489_p6 = scmp.lt.u32.totalorder %s3485_s23, %s4894_s8 }
  0x37   :  { %p3491_p7 = pnand %p3489_p6, %p3486_p5 }
  0x39   :  { %3494 = shalt.err (!%p3491_p7)
}
  0x3a   :  { %s3495_s4 = scalar_lea.vmem %s96_s16, 256  ;;  %p3500_p9 = scmp.lt.s32.totalorder %s96_s16, %s96_s16 }
  0x3b   :  { %p3496_p8 = scmp.ne.s32.totalorder %s96_s16, %s3495_s4  ;;  %p3501_p10 = scmp.lt.s32.totalorder %s3495_s4, %s3495_s4 }
  0x3d   :  { %p3502_p11 = por %p3501_p10, %p3500_p9 }
  0x3f   :  { %p3503_p12 = pnand %p3502_p11, %p3496_p8 }
  0x41   :  { %3506 = shalt.err (!%p3503_p12)
}
  0x42   :  { %101 = dma.hbm_to_vmem [thread:$0]  %s4894_s8, 256, %s96_s16, [#allocation14], %s3656_s18, %s3656_s18, %s3657_s19  }
  0x43   :  { %s3507_s24 = scalar_lea.hbm %s4887_s1, 2048 }
  0x44   :  { %p3508_p13 = scmp.ne.s32.totalorder %s4887_s1, %s3507_s24  ;;  %p3511_p0 = scmp.lt.u32.totalorder %s3507_s24, %s4887_s1 }
  0x46   :  { %p3513_p1 = pnand %p3511_p0, %p3508_p13 }
  0x48   :  { %3516 = shalt.err (!%p3513_p1)
}
  0x49   :  { %s3517_s23 = scalar_lea.vmem %s3796_s20, 2048  ;;  %p3522_p3 = scmp.lt.s32.totalorder %s3796_s20, %s3796_s20 }
  0x4a   :  { %p3518_p2 = scmp.ne.s32.totalorder %s3796_s20, %s3517_s23  ;;  %p3523_p4 = scmp.lt.s32.totalorder %s3517_s23, %s3517_s23 }
  0x4c   :  { %p3524_p5 = por %p3523_p4, %p3522_p3 }
  0x4e   :  { %p3525_p6 = pnand %p3524_p5, %p3518_p2 }
  0x50   :  { %3528 = shalt.err (!%p3525_p6)
}
  0x51   :  { %41 = dma.hbm_to_vmem [thread:$0]  %s4887_s1, 2048, %s3796_s20, [#allocation5], %s3656_s18, %s3656_s18, %s3657_s19  }
  0x52   :  { %s3660_s25 = smov [#allocation9]   ;;  %s3661_s28 = smov [#allocation12]  }
  0x53   :  { %s60_s27 = sshll.u32 %s3660_s25, 4  ;;  %s86_s0 = sshll.u32 %s3661_s28, 4  ;;  %s61_s27 = int_to_ptr.vmem [resolvable:$true] %s60_s27  ;;  %s87_s0 = int_to_ptr.vmem [resolvable:$true] %s86_s0 }
  0x54   :  { %s3529_s29 = scalar_lea.hbm %s4889_s3, 128 }
  0x55   :  { %p3530_p7 = scmp.ne.s32.totalorder %s4889_s3, %s3529_s29  ;;  %p3533_p8 = scmp.lt.u32.totalorder %s3529_s29, %s4889_s3 }
  0x57   :  { %p3535_p9 = pnand %p3533_p8, %p3530_p7 }
  0x59   :  { %3538 = shalt.err (!%p3535_p9)
}
  0x5a   :  { %s3539_s1 = scalar_lea.vmem %s61_s27, 128  ;;  %p3544_p11 = scmp.lt.s32.totalorder %s61_s27, %s61_s27 }
  0x5b   :  { %p3540_p10 = scmp.ne.s32.totalorder %s61_s27, %s3539_s1  ;;  %p3545_p12 = scmp.lt.s32.totalorder %s3539_s1, %s3539_s1 }
  0x5d   :  { %p3546_p13 = por %p3545_p12, %p3544_p11 }
  0x5f   :  { %p3547_p0 = pnand %p3546_p13, %p3540_p10 }
  0x61   :  { %3550 = shalt.err (!%p3547_p0)
}
  0x62   :  { %63 = dma.hbm_to_vmem [thread:$0]  %s4889_s3, 128, %s61_s27, [#allocation8]  }
  0x63   :  { %s3551_s21 = scalar_lea.hbm %s4893_s7, 16 }
  0x64   :  { %p3552_p1 = scmp.ne.s32.totalorder %s4893_s7, %s3551_s21  ;;  %p3555_p2 = scmp.lt.u32.totalorder %s3551_s21, %s4893_s7 }
  0x66   :  { %p3557_p3 = pnand %p3555_p2, %p3552_p1 }
  0x68   :  { %3560 = shalt.err (!%p3557_p3)
}
  0x69   :  { %s3561_s25 = scalar_lea.vmem %s87_s0, 16  ;;  %s3565_s28 = scalar_lea.vmem %s87_s0, 32 }
  0x6a   :  { %p3562_p4 = scmp.ne.s32.totalorder %s87_s0, %s3561_s25  ;;  %p3566_p5 = scmp.lt.s32.totalorder %s87_s0, %s87_s0 }
  0x6b   :  { %p3567_p6 = scmp.lt.s32.totalorder %s3565_s28, %s3561_s25 }
  0x6d   :  { %p3568_p7 = por %p3567_p6, %p3566_p5 }
  0x6f   :  { %p3569_p8 = pnand %p3568_p7, %p3562_p4 }
  0x71   :  { %3572 = shalt.err (!%p3569_p8)
}
  0x72   :  { %89 = dma.hbm_to_vmem [thread:$0]  %s4893_s7, 16, %s87_s0, [#allocation11]  }
  0x73   :  { %s3662_s4 = smov [#allocation15]   ;;  %s3573_s2 = scalar_lea.hbm %s4895_s9, 16 }
  0x74   :  { %s108_s26 = sshll.u32 %s3662_s4, 4  ;;  %p3574_p9 = scmp.ne.s32.totalorder %s4895_s9, %s3573_s2  ;;  %s109_s26 = int_to_ptr.vmem [resolvable:$true] %s108_s26 }
  0x75   :  { %p3577_p10 = scmp.lt.u32.totalorder %s3573_s2, %s4895_s9 }
  0x77   :  { %p3579_p11 = pnand %p3577_p10, %p3574_p9 }
  0x79   :  { %3582 = shalt.err (!%p3579_p11)
}
  0x7a   :  { %s3583_s19 = scalar_lea.vmem %s109_s26, 16  ;;  %s3587_s7 = scalar_lea.vmem %s109_s26, 32 }
  0x7b   :  { %p3584_p12 = scmp.ne.s32.totalorder %s109_s26, %s3583_s19  ;;  %p3588_p13 = scmp.lt.s32.totalorder %s109_s26, %s109_s26 }
  0x7c   :  { %p3589_p0 = scmp.lt.s32.totalorder %s3587_s7, %s3583_s19 }
  0x7e   :  { %p3590_p1 = por %p3589_p0, %p3588_p13 }
  0x80   :  { %p3591_p2 = pnand %p3590_p1, %p3584_p12 }
  0x82   :  { %3594 = shalt.err (!%p3591_p2)
}
  0x83   :  { %111 = dma.hbm_to_vmem [thread:$0]  %s4895_s9, 16, %s109_s26, [#allocation14]  }
  0x84   :  { %3641 = dma.done.wait [#allocation5], 2048  }
  0x85   :  { %3642 = vsyncadd [#allocation5], 4294965248 }
  0x86   :  { %3643 = dma.done.wait [#allocation8], 1152  }
  0x87   :  { %3644 = vsyncadd [#allocation8], 4294966144 }
  0x88   :  { %3645 = dma.done.wait [#allocation11], 272  }
  0x89   :  { %3646 = vsyncadd [#allocation11], 4294967024 }
  0x8a   :  { %3647 = dma.done.wait [#allocation14], 272  }
  0x8b   :  { %3648 = vsyncadd [#allocation14], 4294967024  ;;  %vm174_vm0 = vcmask 130048   ;;  %v165_v0 = vld [vmem:[#allocation10] sm:$0xff]  ;;  %v166_v1 = vld [vmem:[#allocation10 + $0x8] sm:$0xff]  ;;  %v384_v20 = vlaneseq  ;;  %vm404_vm1 = vcmask 261120  }
  0x8c   :  { %v3869_v2 = vld [vmem:[#allocation4] sm:$0xff]  ;;  %v3169_v3 = vpack.c.bf16 %v166_v1, %v165_v0  ;;  %v3873_v4 = vld [vmem:[#allocation4 + $0x8] sm:$0xff]  ;;  %v3875_v5 = vld [vmem:[#allocation4 + $0x10] sm:$0xff]  ;;  %s453_s22 = sld [smem:[#allocation3]]  ;;  %vm498_vm2 = vcmask 130112   ;;  %vm563_vm3 = vcmask 1041409  }
  0x8d   :  { %3115 = vmatprep.mubr.msk.f32.mxu0 %vm174_vm0, %v3869_v2  ;;  %v3877_v6 = vld [vmem:[#allocation4 + $0x70] sm:$0xff]  ;;  %v3879_v7 = vld [vmem:[#allocation4 + $0x78] sm:$0xff]  ;;  %v3891_v9 = vld [vmem:[#allocation4 + $0x20] sm:$0xff]  ;;  %v3947_v27 = vshrl.u32 %v384_v20, 7  ;;  %vm565_vm4 = vcmask 1042434   ;;  %vm567_vm5 = vcmask 1043459  }
  0x8e   :  { %3170 = vmatprep.subr.bf16.mxu0 %v3169_v3  ;;  %3183 = vmatprep.subr.bf16.mxu1 %v3169_v3  ;;  %4919 = vst [vmem:[#allocation26_spill] sm:$0xff] %v3879_v7  ;;  %v3889_v8 = vld [vmem:[#allocation4 + $0x18] sm:$0xff]  ;;  %v3897_v10 = vld [vmem:[#allocation4 + $0x28] sm:$0xff]  ;;  %v3899_v11 = vld [vmem:[#allocation4 + $0x30] sm:$0xff]  ;;  %vm569_vm6 = vcmask 1044484   ;;  %vm571_vm7 = vcmask 1045509  }
  0x8f   :  { %3172 = vmatpush3.bf16.msra.mxu0 %v3169_v3  ;;  %3184 = vmatpush3.bf16.msra.mxu1 %v3169_v3  ;;  %v3905_v12 = vld [vmem:[#allocation4 + $0x38] sm:$0xff]  ;;  %v3907_v13 = vld [vmem:[#allocation4 + $0x40] sm:$0xff]  ;;  %v3913_v14 = vld [vmem:[#allocation4 + $0x48] sm:$0xff]  ;;  %4922 = vst [vmem:[#allocation29_spill] sm:$0xff] %v3947_v27  ;;  %v3958_v32 = vsub.s32 0, %v3947_v27  ;;  %vm573_vm8 = vcmask 1046534  }
  0x90   :  { %3136 = vmatprep.mubr.msk.f32.mxu1 %vm174_vm0, %v3877_v6  ;;  %v3915_v15 = vld [vmem:[#allocation4 + $0x50] sm:$0xff]  ;;  %v3921_v16 = vld [vmem:[#allocation4 + $0x58] sm:$0xff]  ;;  %v3923_v17 = vld [vmem:[#allocation4 + $0x60] sm:$0xff]  ;;  %vm575_vm9 = vcmask 1047559   ;;  %vm3665_vm10 = vmmov 0   ;;  %vm1733_vm11 = vcmask 64512  }
  0x91   :  { %v3929_v18 = vld [vmem:[#allocation4 + $0x68] sm:$0xff]  ;;  %v3936_v19 = vld [vmem:[%s4891_s5] ss:$0 sm:$0xff]  ;;  %s3669_s30 = smov 96   ;;  %s3076_s2 = sld [smem:[#allocation3 + $0x2]] }
  0x92   :  { %3116 = vmatmul.mubr.msk.f32.vlgmr.msra.gmra.mrb[0].mxu0 %vm174_vm0, %v3873_v4  ;;  %3137 = vmatmul.mubr.msk.f32.vlgmr.msra.gmra.mrb[0].mxu1 %vm174_vm0, %v3879_v7  ;;  %v164_v33 = vld [vmem:[%s4898_s12] sm:$0x7]  ;;  %s3670_s24 = smov [#allocation17]  }
  0x93   :  { %3118 = vmatprep.mubr.msk.f32.mxu0 %vm174_vm0, %v3875_v5  ;;  %v3972_v38 = vrot.slane %v164_v33, %v3958_v32  ;;  %s3029_s15 = sshll.u32 %s3670_s24, 4  ;;  %s3030_s15 = int_to_ptr.vmem [resolvable:$true] %s3029_s15 }
  0x94   :  { %s3595_s1 = scalar_lea.vmem %s3030_s15, 128  ;;  %p3600_p4 = scmp.lt.s32.totalorder %s3030_s15, %s3030_s15 }
  0x95   :  { %p3596_p3 = scmp.ne.s32.totalorder %s3030_s15, %s3595_s1  ;;  %p3601_p5 = scmp.lt.s32.totalorder %s3595_s1, %s3595_s1 }
  0x96   :  { %3119 = vmatmul.mubr.msk.f32.gmra.mrb[2].mxu0 %vm174_vm0, %v3889_v8 }
  0x97   :  { %3121 = vmatprep.mubr.msk.f32.mxu0 %vm174_vm0, %v3891_v9  ;;  %p3602_p6 = por %p3601_p5, %p3600_p4 }
  0x99   :  { %p3603_p7 = pnand %p3602_p6, %p3596_p3 }
  0x9a   :  { %3122 = vmatmul.mubr.msk.f32.gmra.mrb[4].mxu0 %vm174_vm0, %v3897_v10 }
  0x9b   :  { %3124 = vmatprep.mubr.msk.f32.mxu0 %vm174_vm0, %v3899_v11 }
  0x9e   :  { %3125 = vmatmul.mubr.msk.f32.gmra.mrb[6].mxu0 %vm174_vm0, %v3905_v12 }
  0x9f   :  { %3127 = vmatprep.mubr.msk.f32.mxu0 %vm174_vm0, %v3907_v13 }
  0xa2   :  { %3128 = vmatmul.mubr.msk.f32.gmra.mrb[8].mxu0 %vm174_vm0, %v3913_v14 }
  0xa3   :  { %3130 = vmatprep.mubr.msk.f32.mxu0 %vm174_vm0, %v3915_v15 }
  0xa6   :  { %3131 = vmatmul.mubr.msk.f32.gmra.mrb[10].mxu0 %vm174_vm0, %v3921_v16 }
  0xa7   :  { %3133 = vmatprep.mubr.msk.f32.mxu0 %vm174_vm0, %v3923_v17 }
  0xaa   :  { %3134 = vmatmul.mubr.msk.f32.gmra.mrb[12].mxu0 %vm174_vm0, %v3929_v18 }
 0x165   :  { %v3117_v21 = vpop.f32.mrb[0].mxu0  ;;  %v3938_v22 = vpop.f32.mrb[0].mxu1 }
 0x166   :  { %v3941_v23 = vadd.f32 %v3117_v21, %v3936_v19  ;;  %v289_v24 = vpop.f32.mrb[1].mxu0  ;;  %v359_v25 = vpop.f32.mrb[1].mxu1 }
 0x167   :  { %v3944_v26 = vadd.f32 %v3936_v19, %v289_v24  ;;  %v4007_v1 = vadd.f32 %v3936_v19, %v359_v25  ;;  %v4019_v25 = vadd.f32 %v3938_v22, %v3936_v19 }
 0x168   :  { %4920 = vst [vmem:[#allocation27_spill] sm:$0xff] %v3941_v23  ;;  %3206 = vtanh.f32 %v3941_v23 }
 0x169   :  { %4921 = vst [vmem:[#allocation28_spill] sm:$0xff] %v3944_v26  ;;  %3208 = vtanh.f32 %v3944_v26  ;;  %v3120_v28 = vpop.f32.mrb[2].mxu0  ;;  %4933 = vst [vmem:[#allocation40_spill] sm:$0xff] %v4007_v1 }
 0x16a   :  { %v3952_v29 = vadd.f32 %v3120_v28, %v3936_v19  ;;  %v299_v30 = vpop.f32.mrb[3].mxu0  ;;  %4935 = vst [vmem:[#allocation42_spill] sm:$0xff] %v4019_v25 }
 0x16b   :  { %v3955_v31 = vadd.f32 %v3936_v19, %v299_v30 }
 0x16c   :  { %4923 = vst [vmem:[#allocation30_spill] sm:$0xff] %v3952_v29  ;;  %3210 = vtanh.f32 %v3952_v29 }
 0x16d   :  { %4924 = vst [vmem:[#allocation31_spill] sm:$0xff] %v3955_v31  ;;  %3212 = vtanh.f32 %v3955_v31  ;;  %v3123_v34 = vpop.f32.mrb[4].mxu0 }
 0x16e   :  { %v3966_v35 = vadd.f32 %v3123_v34, %v3936_v19  ;;  %v309_v36 = vpop.f32.mrb[5].mxu0 }
 0x16f   :  { %v3969_v37 = vadd.f32 %v3936_v19, %v309_v36 }
 0x170   :  { %4925 = vst [vmem:[#allocation32_spill] sm:$0xff] %v3966_v35  ;;  %3214 = vtanh.f32 %v3966_v35 }
 0x171   :  { %4926 = vst [vmem:[#allocation33_spill] sm:$0xff] %v3969_v37  ;;  %3216 = vtanh.f32 %v3969_v37  ;;  %v3126_v39 = vpop.f32.mrb[6].mxu0 }
 0x172   :  { %v3207_v40 = vpop.eup %3206  ;;  %v3977_v41 = vadd.f32 %v3126_v39, %v3936_v19  ;;  %v319_v42 = vpop.f32.mrb[7].mxu0 }
 0x173   :  { %v3209_v43 = vpop.eup %3208  ;;  %v3980_v44 = vadd.f32 %v3936_v19, %v319_v42  ;;  %v389_v45 = vmul.f32 %v3207_v40, %v3972_v38 }
 0x174   :  { %4927 = vst [vmem:[#allocation34_spill] sm:$0xff] %v3977_v41  ;;  %3218 = vtanh.f32 %v3977_v41  ;;  %v388_v48 = vmul.f32 %v3209_v43, %v3972_v38 }
 0x175   :  { %4928 = vst [vmem:[#allocation35_spill] sm:$0xff] %v3980_v44  ;;  %3220 = vtanh.f32 %v3980_v44  ;;  %v408_v46 = vsel %vm404_vm1, %v389_v45, 0.0  ;;  %v3129_v47 = vpop.f32.mrb[8].mxu0 }
 0x176   :  { %v3211_v49 = vpop.eup %3210  ;;  %409 = vadd.xlane.f32.xlu0 %v408_v46  ;;  %v3988_v50 = vadd.f32 %v3129_v47, %v3936_v19  ;;  %v329_v51 = vpop.f32.mrb[9].mxu0  ;;  %v405_v56 = vsel %vm404_vm1, %v388_v48, 0.0 }
 0x177   :  { %v3213_v52 = vpop.eup %3212  ;;  %v3991_v53 = vadd.f32 %v3936_v19, %v329_v51  ;;  %v391_v54 = vmul.f32 %v3211_v49, %v3972_v38 }
 0x178   :  { %4929 = vst [vmem:[#allocation36_spill] sm:$0xff] %v3988_v50  ;;  %3222 = vtanh.f32 %v3988_v50  ;;  %v390_v58 = vmul.f32 %v3213_v52, %v3972_v38 }
 0x179   :  { %4930 = vst [vmem:[#allocation37_spill] sm:$0xff] %v3991_v53  ;;  %3224 = vtanh.f32 %v3991_v53  ;;  %v414_v55 = vsel %vm404_vm1, %v391_v54, 0.0  ;;  %v3132_v57 = vpop.f32.mrb[10].mxu0 }
 0x17a   :  { %v3215_v59 = vpop.eup %3214  ;;  %415 = vadd.xlane.f32.xlu1 %v414_v55  ;;  %406 = vadd.xlane.f32.xlu0 %v405_v56  ;;  %v4000_v60 = vadd.f32 %v3132_v57, %v3936_v19  ;;  %v339_v61 = vpop.f32.mrb[11].mxu0  ;;  %v411_v21 = vsel %vm404_vm1, %v390_v58, 0.0 }
 0x17b   :  { %v3217_v62 = vpop.eup %3216  ;;  %v4003_v63 = vadd.f32 %v3936_v19, %v339_v61  ;;  %v393_v0 = vmul.f32 %v3215_v59, %v3972_v38 }
 0x17c   :  { %4931 = vst [vmem:[#allocation38_spill] sm:$0xff] %v4000_v60  ;;  %3226 = vtanh.f32 %v4000_v60  ;;  %v392_v3 = vmul.f32 %v3217_v62, %v3972_v38 }
 0x17d   :  { %4932 = vst [vmem:[#allocation39_spill] sm:$0xff] %v4003_v63  ;;  %3228 = vtanh.f32 %v4003_v63  ;;  %v3135_v24 = vpop.f32.mrb[12].mxu0  ;;  %v420_v40 = vsel %vm404_vm1, %v393_v0, 0.0 }
 0x17e   :  { %v3219_v28 = vpop.eup %3218  ;;  %412 = vadd.xlane.f32.xlu1 %v411_v21  ;;  %v4014_v30 = vadd.f32 %v3135_v24, %v3936_v19  ;;  %v349_v33 = vpop.f32.mrb[13].mxu0  ;;  %v417_v34 = vsel %vm404_vm1, %v392_v3, 0.0  ;;  %3230 = vtanh.f32 %v4007_v1 }
 0x17f   :  { %v3221_v36 = vpop.eup %3220  ;;  %v4022_v39 = vadd.f32 %v3936_v19, %v349_v33  ;;  %418 = vadd.xlane.f32.xlu0 %v417_v34  ;;  %v395_v42 = vmul.f32 %v3219_v28, %v3972_v38 }
 0x180   :  { %4934 = vst [vmem:[#allocation41_spill] sm:$0xff] %v4014_v30  ;;  %3232 = vtanh.f32 %v4014_v30  ;;  %v394_v43 = vmul.f32 %v3221_v36, %v3972_v38 }
 0x181   :  { %4936 = vst [vmem:[#allocation43_spill] sm:$0xff] %v4022_v39  ;;  %3234 = vtanh.f32 %v4022_v39  ;;  %v426_v46 = vsel %vm404_vm1, %v395_v42, 0.0  ;;  %v163_v42 = vld [vmem:[#allocation9] sm:$0xff] }
 0x182   :  { %v3223_v45 = vpop.eup %3222  ;;  %421 = vadd.xlane.f32.xlu1 %v420_v40  ;;  %3236 = vtanh.f32 %v4019_v25  ;;  %v423_v19 = vsel %vm404_vm1, %v394_v43, 0.0  ;;  %v674_v43 = vrot.slane %v163_v42, %v3958_v32 }
 0x183   :  { %v3225_v22 = vpop.eup %3224  ;;  %424 = vadd.xlane.f32.xlu0 %v423_v19  ;;  %v397_v47 = vmul.f32 %v3223_v45, %v3972_v38  ;;  %v4051_v45 = vsub.s32 2, %v3947_v27 }
 0x184   :  { %v396_v48 = vmul.f32 %v3225_v22, %v3972_v38  ;;  %v4055_v22 = vsub.s32 3, %v3947_v27 }
 0x185   :  { %v432_v54 = vsel %vm404_vm1, %v397_v47, 0.0  ;;  %v696_v19 = vrot.slane %v163_v42, %v4051_v45  ;;  %v4062_v47 = vsub.s32 4, %v3947_v27 }
 0x186   :  { %v3227_v49 = vpop.eup %3226  ;;  %427 = vadd.xlane.f32.xlu1 %v426_v46  ;;  %v429_v51 = vsel %vm404_vm1, %v396_v48, 0.0  ;;  %v707_v46 = vrot.slane %v163_v42, %v4055_v22 }
 0x187   :  { %v3229_v52 = vpop.eup %3228  ;;  %430 = vadd.xlane.f32.xlu0 %v429_v51  ;;  %v399_v55 = vmul.f32 %v3227_v49, %v3972_v38  ;;  %v718_v49 = vrot.slane %v163_v42, %v4062_v47  ;;  %v4067_v51 = vsub.s32 5, %v3947_v27 }
 0x188   :  { %v398_v56 = vmul.f32 %v3229_v52, %v3972_v38  ;;  %v3231_v57 = vpop.eup %3230 }
 0x189   :  { %v438_v62 = vsel %vm404_vm1, %v399_v55, 0.0  ;;  %v402_v24 = vmul.f32 %v3231_v57, %v3972_v38  ;;  %v4070_v52 = vrot.slane %v163_v42, %v4067_v51 }
 0x18a   :  { %v3233_v58 = vpop.eup %3232  ;;  %433 = vadd.xlane.f32.xlu1 %v432_v54  ;;  %v435_v59 = vsel %vm404_vm1, %v398_v56, 0.0  ;;  %v4073_v54 = vsub.s32 6, %v3947_v27  ;;  %v4080_v56 = vsub.s32 7, %v3947_v27 }
 0x18b   :  { %v3235_v61 = vpop.eup %3234  ;;  %436 = vadd.xlane.f32.xlu0 %v435_v59  ;;  %v401_v0 = vmul.f32 %v3233_v58, %v3972_v38  ;;  %v447_v36 = vsel %vm404_vm1, %v402_v24, 0.0  ;;  %v488_v24 = vand.u32 127, %v384_v20 }
 0x18c   :  { %v3237_v3 = vpop.eup %3236  ;;  %v400_v21 = vmul.f32 %v3235_v61, %v3972_v38  ;;  %v4077_v55 = vrot.slane %v163_v42, %v4073_v54  ;;  %v4084_v57 = vrot.slane %v163_v42, %v4080_v56 }
 0x18d   :  { %v444_v33 = vsel %vm404_vm1, %v401_v0, 0.0  ;;  %v403_v34 = vmul.f32 %v3237_v3, %v3972_v38  ;;  %v4058_v38 = vsub.s32 1, %v3947_v27 }
 0x18e   :  { %439 = vadd.xlane.f32.xlu1 %v438_v62  ;;  %v441_v28 = vsel %vm404_vm1, %v400_v21, 0.0 }
 0x18f   :  { %442 = vadd.xlane.f32.xlu0 %v441_v28  ;;  %v450_v40 = vsel %vm404_vm1, %v403_v34, 0.0  ;;  %v685_v48 = vrot.slane %v163_v42, %v4058_v38  ;;  %v493_v34 = vadd.s32 4294967288, %v488_v24 }
 0x191   :  { %v4106_v30 = vsub.s32 %v493_v34, %v3947_v27 }
 0x192   :  { %445 = vadd.xlane.f32.xlu1 %v444_v33 }
 0x193   :  { %448 = vadd.xlane.f32.xlu0 %v447_v36  ;;  %v454_v36 = vstv %s453_s22 }
 0x196   :  { %451 = vadd.xlane.f32.xlu1 %v450_v40 }
 0x1a7   :  { %676 = vbcast.lane.b32.xlu1 %v674_v43, 256 }
 0x1a9   :  { %680 = vbcast.lane.b32.xlu0 %v674_v43, 264 }
 0x1ab   :  { %687 = vbcast.lane.b32.xlu1 %v685_v48, 256 }
 0x1ad   :  { %702 = vbcast.lane.b32.xlu0 %v696_v19, 264 }
 0x1af   :  { %691 = vbcast.lane.b32.xlu1 %v685_v48, 264 }
 0x1b1   :  { %713 = vbcast.lane.b32.xlu0 %v707_v46, 264 }
 0x1b3   :  { %698 = vbcast.lane.b32.xlu1 %v696_v19, 256  ;;  %v4091_v19 = vsub.s32 %v488_v24, %v3947_v27 }
 0x1b5   :  { %724 = vbcast.lane.b32.xlu0 %v718_v49, 264 }
 0x1b7   :  { %709 = vbcast.lane.b32.xlu1 %v707_v46, 256 }
 0x1bb   :  { %720 = vbcast.lane.b32.xlu1 %v718_v49, 256 }
 0x1bf   :  { %731 = vbcast.lane.b32.xlu1 %v4070_v52, 256 }
 0x1c3   :  { %742 = vbcast.lane.b32.xlu1 %v4077_v55, 256 }
 0x1c7   :  { %753 = vbcast.lane.b32.xlu1 %v4084_v57, 256 }
 0x203   :  { %v410_v58 = vpop.xlane.xlu0 %409 }
 0x207   :  { %v416_v59 = vpop.xlane.xlu1 %415  ;;  %v407_v61 = vpop.xlane.xlu0 %406 }
 0x208   :  { %v4097_v49 = vadd.f32 %v454_v36, %v416_v59  ;;  %v4099_v25 = vadd.f32 %v454_v36, %v407_v61 }
 0x20a   :  { %v507_v34 = vrot.slane %v4097_v49, %v4106_v30 }
 0x20b   :  { %v413_v62 = vpop.xlane.xlu1 %412 }
 0x20c   :  { %v419_v0 = vpop.xlane.xlu0 %418  ;;  %v4088_v43 = vadd.f32 %v454_v36, %v413_v62  ;;  %v4108_v62 = vadd.f32 %v454_v36, %v410_v58 }
 0x20d   :  { %v4093_v46 = vadd.f32 %v454_v36, %v419_v0 }
 0x20e   :  { %v503_v59 = vrot.slane %v4088_v43, %v4091_v19  ;;  %v497_v60 = vrot.slane %v4108_v62, %v4106_v30 }
 0x20f   :  { %v422_v3 = vpop.xlane.xlu1 %421 }
 0x210   :  { %v425_v21 = vpop.xlane.xlu0 %424  ;;  %v4095_v48 = vadd.f32 %v454_v36, %v422_v3  ;;  %v508_v44 = vsel %vm498_vm2, %v507_v34, %v503_v59 }
 0x211   :  { %v4101_v20 = vadd.f32 %v454_v36, %v425_v21 }
 0x212   :  { %v516_v58 = vrot.slane %v4095_v48, %v4106_v30 }
 0x213   :  { %v428_v28 = vpop.xlane.xlu1 %427 }
 0x214   :  { %v431_v33 = vpop.xlane.xlu0 %430  ;;  %v4103_v1 = vadd.f32 %v454_v36, %v428_v28  ;;  %v512_v28 = vrot.slane %v4093_v46, %v4091_v19 }
 0x215   :  { %v4110_v39 = vadd.f32 %v454_v36, %v431_v33 }
 0x216   :  { %v517_v29 = vsel %vm498_vm2, %v516_v58, %v512_v28 }
 0x217   :  { %v434_v40 = vpop.xlane.xlu1 %433 }
 0x218   :  { %v437_v42 = vpop.xlane.xlu0 %436  ;;  %v4112_v24 = vadd.f32 %v454_v36, %v434_v40  ;;  %v492_v40 = vrot.slane %v4099_v25, %v4091_v19 }
 0x219   :  { %v4116_v3 = vadd.f32 %v454_v36, %v437_v42  ;;  %v521_v42 = vrot.slane %v4101_v20, %v4091_v19 }
 0x21a   :  { %v534_v63 = vrot.slane %v4112_v24, %v4106_v30  ;;  %v499_v26 = vsel %vm498_vm2, %v497_v60, %v492_v40 }
 0x21b   :  { %v440_v0 = vpop.xlane.xlu1 %439  ;;  %v539_v50 = vrot.slane %v4116_v3, %v4091_v19 }
 0x21c   :  { %v4118_v61 = vadd.f32 %v454_v36, %v440_v0  ;;  %v443_v21 = vpop.xlane.xlu0 %442  ;;  %v525_v0 = vrot.slane %v4103_v1, %v4106_v30 }
 0x21d   :  { %v4124_v33 = vadd.f32 %v454_v36, %v443_v21  ;;  %v530_v21 = vrot.slane %v4110_v39, %v4091_v19 }
 0x21e   :  { %v543_v53 = vrot.slane %v4118_v61, %v4106_v30  ;;  %v526_v59 = vsel %vm498_vm2, %v525_v0, %v521_v42 }
 0x21f   :  { %v446_v41 = vpop.xlane.xlu1 %445  ;;  %v548_v31 = vrot.slane %v4124_v33, %v4091_v19  ;;  %v535_v27 = vsel %vm498_vm2, %v534_v63, %v530_v21 }
 0x220   :  { %v4145_v35 = vadd.f32 %v454_v36, %v446_v41  ;;  %v449_v37 = vpop.xlane.xlu0 %448  ;;  %v564_v41 = vsel %vm563_vm3, %v508_v44, %v499_v26  ;;  %v544_v60 = vsel %vm498_vm2, %v543_v53, %v539_v50 }
 0x221   :  { %v4150_v23 = vadd.f32 %v454_v36, %v449_v37  ;;  %v566_v28 = vsel %vm565_vm4, %v517_v29, %v564_v41 }
 0x222   :  { %v552_v34 = vrot.slane %v4145_v35, %v4106_v30  ;;  %v568_v42 = vsel %vm567_vm5, %v526_v59, %v566_v28 }
 0x223   :  { %v452_v7 = vpop.xlane.xlu1 %451  ;;  %v557_v37 = vrot.slane %v4150_v23, %v4091_v19  ;;  %v570_v44 = vsel %vm569_vm6, %v535_v27, %v568_v42 }
 0x224   :  { %v4161_v58 = vadd.f32 %v454_v36, %v452_v7  ;;  %v553_v40 = vsel %vm498_vm2, %v552_v34, %v548_v31  ;;  %v572_v29 = vsel %vm571_vm7, %v544_v60, %v570_v44  ;;  %v3663_v31 = vmov 0   ;;  %v681_v27 = vpop.permute.xlu0 %680 }
 0x225   :  { %v574_v7 = vsel %vm573_vm8, %v553_v40, %v572_v29  ;;  %3205 = vset.pattern.permute.xlu0 %v3663_v31  ;;  %3204 = vset.pattern.permute.xlu1 %v3663_v31 }
 0x226   :  { %v561_v26 = vrot.slane %v4161_v58, %v4106_v30 }
 0x227   :  { %v677_v59 = vpop.permute.xlu1 %676 }
 0x228   :  { %v562_v63 = vsel %vm498_vm2, %v561_v26, %v557_v37  ;;  %v4177_v53 = vpop.permute.xlu0 %702 }
 0x229   :  { %v576_v36 = vsel %vm575_vm9, %v562_v63, %v574_v7 }
 0x22a   :  { %v578_v50 = vsel %vm174_vm0, %v576_v36, -inf }
 0x22b   :  { %579 = vmax.xlane.f32.xlu0 %v578_v50  ;;  %v688_v28 = vpop.permute.xlu1 %687 }
 0x22c   :  { %v4179_v0 = vpop.permute.xlu0 %713 }
 0x22f   :  { %v692_v26 = vpop.permute.xlu1 %691 }
 0x230   :  { %v4181_v21 = vpop.permute.xlu0 %724 }
 0x241   :  { %735 = vbcast.lane.b32.xlu0 %v4070_v52, 264 }
 0x245   :  { %746 = vbcast.lane.b32.xlu0 %v4077_v55, 264 }
 0x249   :  { %757 = vbcast.lane.b32.xlu0 %v4084_v57, 264 }
 0x2b8   :  { %v580_v34 = vpop.xlane.xlu0 %579 }
 0x2b9   :  { %v585_v41 = vrot.slane %v580_v34, %v3958_v32  ;;  %v593_v52 = vrot.slane %v580_v34, %v4051_v45  ;;  %v589_v55 = vrot.slane %v580_v34, %v4058_v38  ;;  %v597_v60 = vrot.slane %v580_v34, %v4055_v22 }
 0x2ba   :  { %v601_v7 = vrot.slane %v580_v34, %v4062_v47 }
 0x2bb   :  { %v623_v57 = vsub.f32 %v4108_v62, %v585_v41  ;;  %v622_v37 = vsub.f32 %v4099_v25, %v585_v41  ;;  %v626_v40 = vsub.f32 %v4093_v46, %v593_v52  ;;  %v624_v42 = vsub.f32 %v4088_v43, %v589_v55  ;;  %v699_v25 = vpop.permute.xlu1 %698 }
 0x2bc   :  { %v628_v63 = vsub.f32 %v4101_v20, %v597_v60  ;;  %v625_v31 = vsub.f32 %v4097_v49, %v589_v55  ;;  %v630_v41 = vsub.f32 %v4110_v39, %v601_v7  ;;  %v605_v46 = vrot.slane %v580_v34, %v4067_v51 }
 0x2bd   :  { %v640_v44 = vmul.f32 1.442695, %v623_v57  ;;  %v638_v29 = vmul.f32 1.442695, %v622_v37  ;;  %v646_v36 = vmul.f32 1.442695, %v626_v40  ;;  %v627_v57 = vsub.f32 %v4095_v48, %v593_v52 }
 0x2be   :  { %v642_v50 = vmul.f32 1.442695, %v624_v42  ;;  %v650_v62 = vmul.f32 1.442695, %v628_v63  ;;  %v644_v43 = vmul.f32 1.442695, %v625_v31  ;;  %v632_v37 = vsub.f32 %v4116_v3, %v605_v46 }
 0x2bf   :  { %3238 = vpow2.f32 %v640_v44  ;;  %v654_v20 = vmul.f32 1.442695, %v630_v41  ;;  %v609_v40 = vrot.slane %v580_v34, %v4073_v54  ;;  %v648_v49 = vmul.f32 1.442695, %v627_v57  ;;  %v710_v42 = vpop.permute.xlu1 %709 }
 0x2c0   :  { %3240 = vpow2.f32 %v638_v29  ;;  %v629_v55 = vsub.f32 %v4103_v1, %v597_v60  ;;  %v658_v39 = vmul.f32 1.442695, %v632_v37  ;;  %v613_v63 = vrot.slane %v580_v34, %v4080_v56 }
 0x2c1   :  { %3242 = vpow2.f32 %v646_v36  ;;  %v634_v29 = vsub.f32 %v4124_v33, %v609_v40  ;;  %v631_v3 = vsub.f32 %v4112_v24, %v601_v7 }
 0x2c2   :  { %3244 = vpow2.f32 %v642_v50  ;;  %v652_v52 = vmul.f32 1.442695, %v629_v55  ;;  %v636_v33 = vsub.f32 %v4150_v23, %v613_v63  ;;  %v637_v55 = vsub.f32 %v4161_v58, %v613_v63 }
 0x2c3   :  { %3246 = vpow2.f32 %v650_v62  ;;  %v721_v1 = vpop.permute.xlu1 %720  ;;  %v662_v60 = vmul.f32 1.442695, %v634_v29  ;;  %v656_v41 = vmul.f32 1.442695, %v631_v3  ;;  %v1004_v58 = vsel %vm174_vm0, %v3873_v4, 0.0 }
 0x2c4   :  { %3248 = vpow2.f32 %v644_v43  ;;  %v666_v43 = vmul.f32 1.442695, %v636_v33 }
 0x2c5   :  { %3250 = vpow2.f32 %v654_v20  ;;  %v635_v20 = vsub.f32 %v4145_v35, %v609_v40 }
 0x2c6   :  { %3252 = vpow2.f32 %v648_v49 }
 0x2c7   :  { %3254 = vpow2.f32 %v658_v39  ;;  %v664_v49 = vmul.f32 1.442695, %v635_v20  ;;  %v668_v39 = vmul.f32 1.442695, %v637_v55 }
 0x2c8   :  { %3256 = vpow2.f32 %v652_v52  ;;  %v736_v52 = vpop.permute.xlu0 %735 }
 0x2c9   :  { %v3239_v44 = vpop.eup %3238  ;;  %3258 = vpow2.f32 %v662_v60 }
 0x2ca   :  { %v3241_v36 = vpop.eup %3240  ;;  %v4202_v48 = vmul.f32 %v3239_v44, %v681_v27  ;;  %v633_v27 = vsub.f32 %v4118_v61, %v605_v46  ;;  %3260 = vpow2.f32 %v656_v41  ;;  %v1013_v41 = vsel %vm174_vm0, %v3889_v8, 0.0 }
 0x2cb   :  { %v3243_v50 = vpop.eup %3242  ;;  %v4205_v31 = vmul.f32 %v3241_v36, %v677_v59  ;;  %3262 = vpow2.f32 %v666_v43  ;;  %v1003_v36 = vsel %vm174_vm0, %v3869_v2, 0.0  ;;  %v1022_v8 = vsel %vm174_vm0, %v3897_v10, 0.0 }
 0x2cc   :  { %v3245_v62 = vpop.eup %3244  ;;  %811 = vperm.xlu0 %3205, %v4202_v48   ;;  %v4211_v34 = vmul.f32 %v3243_v50, %v699_v25  ;;  %v660_v23 = vmul.f32 1.442695, %v633_v27  ;;  %v732_v25 = vpop.permute.xlu1 %731  ;;  %v1005_v3 = vadd.f32 %v1004_v58, %v1003_v36  ;;  %v1012_v27 = vsel %vm174_vm0, %v3875_v5, 0.0 }
 0x2cd   :  { %808 = vperm.xlu1 %3204, %v4205_v31   ;;  %v3247_v24 = vpop.eup %3246  ;;  %v4213_v7 = vmul.f32 %v3245_v62, %v688_v28  ;;  %v747_v4 = vpop.permute.xlu0 %746  ;;  %v1014_v43 = vadd.f32 %v1013_v41, %v1012_v27  ;;  %v1021_v5 = vsel %vm174_vm0, %v3891_v9, 0.0  ;;  %v1039_v9 = vsel %vm174_vm0, %v3907_v13, 0.0 }
 0x2ce   :  { %v3249_v59 = vpop.eup %3248  ;;  %v4217_v57 = vmul.f32 %v3247_v24, %v710_v42  ;;  %3264 = vpow2.f32 %v660_v23  ;;  %v1006_v33 = vrot.slane %v1005_v3, 4  ;;  %v1040_v10 = vsel %vm174_vm0, %v3913_v14, 0.0 }
 0x2cf   :  { %v3251_v61 = vpop.eup %3250  ;;  %v4220_v46 = vmul.f32 %v3249_v59, %v692_v26  ;;  %3266 = vpow2.f32 %v664_v49  ;;  %v1015_v55 = vrot.slane %v1014_v43, 4  ;;  %v1048_v27 = vsel %vm174_vm0, %v3915_v15, 0.0 }
 0x2d0   :  { %820 = vperm.xlu0 %3205, %v4211_v34   ;;  %v3253_v37 = vpop.eup %3252  ;;  %v4224_v28 = vmul.f32 %v3251_v61, %v721_v1  ;;  %v743_v26 = vpop.permute.xlu1 %742  ;;  %3268 = vpow2.f32 %v668_v39  ;;  %v1049_v13 = vsel %vm174_vm0, %v3921_v16, 0.0  ;;  %v1058_v15 = vsel %vm174_vm0, %v3929_v18, 0.0 }
 0x2d1   :  { %814 = vperm.xlu1 %3204, %v4213_v7   ;;  %v3255_v42 = vpop.eup %3254  ;;  %v4228_v35 = vmul.f32 %v3253_v37, %v4177_v53  ;;  %v1016_v39 = vadd.f32 %v1015_v55, %v1014_v43 }
 0x2d2   :  { %v3257_v40 = vpop.eup %3256  ;;  %v4232_v44 = vmul.f32 %v3255_v42, %v732_v25  ;;  %v758_v25 = vpop.permute.xlu0 %757  ;;  %v1030_v42 = vsel %vm174_vm0, %v3899_v11, 0.0  ;;  %v1041_v11 = vadd.f32 %v1040_v10, %v1039_v9  ;;  %v4937_v9 = vld [vmem:[#allocation26_spill] sm:$0xff] }
 0x2d3   :  { %v3259_v29 = vpop.eup %3258  ;;  %v4239_v53 = vmul.f32 %v3257_v40, %v4179_v0  ;;  %v1031_v40 = vsel %vm174_vm0, %v3905_v12, 0.0 }
 0x2d4   :  { %826 = vperm.xlu0 %3205, %v4217_v57   ;;  %v3261_v63 = vpop.eup %3260  ;;  %v4243_v50 = vmul.f32 %v3259_v29, %v743_v26  ;;  %v754_v1 = vpop.permute.xlu1 %753  ;;  %v1023_v29 = vadd.f32 %v1022_v8, %v1021_v5  ;;  %v1032_v58 = vadd.f32 %v1031_v40, %v1030_v42  ;;  %v1057_v8 = vsel %vm174_vm0, %v3923_v17, 0.0 }
 0x2d5   :  { %817 = vperm.xlu1 %3204, %v4220_v46   ;;  %v3263_v62 = vpop.eup %3262  ;;  %v4246_v2 = vmul.f32 %v3261_v63, %v4181_v21  ;;  %v1007_v21 = vadd.f32 %v1006_v33, %v1005_v3  ;;  %v1017_v63 = vrot.slane %v1016_v39, 2  ;;  %v1042_v33 = vrot.slane %v1041_v11, 4 }
 0x2d6   :  { %v4250_v0 = vmul.f32 %v3263_v62, %v754_v1  ;;  %v1024_v12 = vrot.slane %v1023_v29, 4  ;;  %v1033_v62 = vrot.slane %v1032_v58, 4  ;;  %v1067_v17 = vsel %vm174_vm0, %v4937_v9, 0.0 }
 0x2d7   :  { %v1008_v23 = vrot.slane %v1007_v21, 2  ;;  %v1043_v43 = vadd.f32 %v1042_v33, %v1041_v11 }
 0x2d8   :  { %832 = vperm.xlu0 %3205, %v4224_v28   ;;  %v3265_v60 = vpop.eup %3264  ;;  %v1025_v1 = vadd.f32 %v1024_v12, %v1023_v29 }
 0x2d9   :  { %823 = vperm.xlu1 %3204, %v4228_v35   ;;  %v4256_v24 = vmul.f32 %v3265_v60, %v736_v52  ;;  %v3267_v59 = vpop.eup %3266  ;;  %v1009_v37 = vadd.f32 %v1008_v23, %v1007_v21  ;;  %v1018_v52 = vadd.f32 %v1017_v63, %v1016_v39 }
 0x2da   :  { %v4260_v20 = vmul.f32 %v3267_v59, %v747_v4  ;;  %v3269_v61 = vpop.eup %3268  ;;  %v1034_v4 = vadd.f32 %v1033_v62, %v1032_v58  ;;  %v1026_v41 = vrot.slane %v1025_v1, 2  ;;  %v1050_v59 = vadd.f32 %v1049_v13, %v1048_v27 }
 0x2db   :  { %v1010_v49 = vrot.slane %v1009_v37, 1  ;;  %v4271_v26 = vmul.f32 %v3269_v61, %v758_v25  ;;  %v1019_v3 = vrot.slane %v1018_v52, 1  ;;  %v1066_v58 = vsel %vm174_vm0, %v3877_v6, 0.0 }
 0x2dc   :  { %838 = vperm.xlu0 %3205, %v4232_v44   ;;  %v1027_v14 = vadd.f32 %v1026_v41, %v1025_v1  ;;  %v1035_v21 = vrot.slane %v1034_v4, 2  ;;  %v1051_v5 = vrot.slane %v1050_v59, 4  ;;  %v1068_v10 = vadd.f32 %v1067_v17, %v1066_v58 }
 0x2dd   :  { %829 = vperm.xlu1 %3204, %v4239_v53   ;;  %v1011_v36 = vadd.f32 %v1010_v49, %v1009_v37  ;;  %v1020_v60 = vadd.f32 %v1019_v3, %v1018_v52  ;;  %v1044_v37 = vrot.slane %v1043_v43, 2  ;;  %v1059_v49 = vadd.f32 %v1058_v15, %v1057_v8 }
 0x2de   :  { %v1028_v23 = vrot.slane %v1027_v14, 1  ;;  %v1036_v25 = vadd.f32 %v1035_v21, %v1034_v4  ;;  %v1052_v42 = vadd.f32 %v1051_v5, %v1050_v59  ;;  %v1069_v12 = vrot.slane %v1068_v10, 4 }
 0x2df   :  { %v1045_v55 = vadd.f32 %v1044_v37, %v1043_v43 }
 0x2e0   :  { %844 = vperm.xlu0 %3205, %v4243_v50   ;;  %v1029_v61 = vadd.f32 %v1028_v23, %v1027_v14  ;;  %v1037_v16 = vrot.slane %v1036_v25, 1  ;;  %v1053_v29 = vrot.slane %v1052_v42, 2 }
 0x2e1   :  { %835 = vperm.xlu1 %3204, %v4246_v2   ;;  %v1046_v39 = vrot.slane %v1045_v55, 1 }
 0x2e2   :  { %v4286_v40 = vadd.f32 %v1037_v16, %v1036_v25  ;;  %v1054_v63 = vadd.f32 %v1053_v29, %v1052_v42 }
 0x2e3   :  { %v1047_v18 = vadd.f32 %v1046_v39, %v1045_v55 }
 0x2e4   :  { %850 = vperm.xlu0 %3205, %v4250_v0   ;;  %v1055_v11 = vrot.slane %v1054_v63, 1 }
 0x2e5   :  { %841 = vperm.xlu1 %3204, %v4256_v24  }
 0x2e6   :  { %v1056_v62 = vadd.f32 %v1055_v11, %v1054_v63 }
 0x2e9   :  { %847 = vperm.xlu1 %3204, %v4260_v20  }
 0x2ed   :  { %853 = vperm.xlu1 %3204, %v4271_v26  }
 0x2f1   :  { %1084 = vbcast.lane.b32.xlu1 %v1011_v36, 256 }
 0x2f5   :  { %1088 = vbcast.lane.b32.xlu1 %v1011_v36, 264  ;;  %v1060_v36 = vrot.slane %v1059_v49, 4 }
 0x2f7   :  { %v1061_v52 = vadd.f32 %v1060_v36, %v1059_v49 }
 0x2f9   :  { %1091 = vbcast.lane.b32.xlu1 %v1020_v60, 256  ;;  %v1062_v3 = vrot.slane %v1061_v52, 2 }
 0x2fb   :  { %v1063_v1 = vadd.f32 %v1062_v3, %v1061_v52 }
 0x2fd   :  { %1095 = vbcast.lane.b32.xlu1 %v1020_v60, 264  ;;  %v1070_v60 = vadd.f32 %v1069_v12, %v1068_v10  ;;  %v1064_v4 = vrot.slane %v1063_v1, 1 }
 0x2ff   :  { %v1071_v6 = vrot.slane %v1070_v60, 2  ;;  %v1065_v33 = vadd.f32 %v1064_v4, %v1063_v1 }
 0x301   :  { %1098 = vbcast.lane.b32.xlu1 %v1029_v61, 256  ;;  %v1072_v27 = vadd.f32 %v1071_v6, %v1070_v60 }
 0x303   :  { %v1073_v13 = vrot.slane %v1072_v27, 1 }
 0x305   :  { %1102 = vbcast.lane.b32.xlu1 %v1029_v61, 264  ;;  %v1074_v41 = vadd.f32 %v1073_v13, %v1072_v27 }
 0x309   :  { %1105 = vbcast.lane.b32.xlu1 %v4286_v40, 256 }
 0x30d   :  { %1112 = vbcast.lane.b32.xlu1 %v1047_v18, 256 }
 0x311   :  { %1116 = vbcast.lane.b32.xlu1 %v1047_v18, 264 }
 0x315   :  { %1119 = vbcast.lane.b32.xlu1 %v1056_v62, 256 }
 0x319   :  { %1123 = vbcast.lane.b32.xlu1 %v1056_v62, 264 }
 0x31d   :  { %1126 = vbcast.lane.b32.xlu1 %v1065_v33, 256 }
 0x321   :  { %1130 = vbcast.lane.b32.xlu1 %v1065_v33, 264 }
 0x325   :  { %1137 = vbcast.lane.b32.xlu1 %v1074_v41, 264 }
 0x34b   :  { %v812_v14 = vpop.permute.xlu0 %811 }
 0x34c   :  { %v809_v59 = vpop.permute.xlu1 %808  ;;  %v862_v29 = vrot.slane %v812_v14, %v4106_v30 }
 0x34d   :  { %v858_v39 = vrot.slane %v809_v59, %v4091_v19 }
 0x34f   :  { %v821_v21 = vpop.permute.xlu0 %820  ;;  %v863_v12 = vsel %vm498_vm2, %v862_v29, %v858_v39 }
 0x350   :  { %v815_v43 = vpop.permute.xlu1 %814  ;;  %v876_v9 = vrot.slane %v821_v21, %v4091_v19 }
 0x351   :  { %v867_v36 = vrot.slane %v815_v43, %v4091_v19 }
 0x353   :  { %v827_v23 = vpop.permute.xlu0 %826 }
 0x354   :  { %v818_v61 = vpop.permute.xlu1 %817  ;;  %v885_v18 = vrot.slane %v827_v23, %v4091_v19 }
 0x355   :  { %v871_v49 = vrot.slane %v818_v61, %v4106_v30 }
 0x357   :  { %v833_v37 = vpop.permute.xlu0 %832  ;;  %v872_v10 = vsel %vm498_vm2, %v871_v49, %v867_v36 }
 0x358   :  { %v824_v25 = vpop.permute.xlu1 %823  ;;  %v894_v11 = vrot.slane %v833_v37, %v4091_v19  ;;  %v927_v4 = vsel %vm563_vm3, %v872_v10, %v863_v12 }
 0x359   :  { %v880_v16 = vrot.slane %v824_v25, %v4106_v30 }
 0x35b   :  { %v839_v8 = vpop.permute.xlu0 %838  ;;  %v881_v52 = vsel %vm498_vm2, %v880_v16, %v876_v9 }
 0x35c   :  { %v830_v5 = vpop.permute.xlu1 %829  ;;  %v903_v1 = vrot.slane %v839_v8, %v4091_v19  ;;  %v928_v13 = vsel %vm565_vm4, %v881_v52, %v927_v4 }
 0x35d   :  { %v889_v58 = vrot.slane %v830_v5, %v4106_v30 }
 0x35f   :  { %v845_v55 = vpop.permute.xlu0 %844  ;;  %v890_v62 = vsel %vm498_vm2, %v889_v58, %v885_v18 }
 0x360   :  { %v836_v15 = vpop.permute.xlu1 %835  ;;  %v912_v33 = vrot.slane %v845_v55, %v4091_v19  ;;  %v929_v59 = vsel %vm567_vm5, %v890_v62, %v928_v13 }
 0x361   :  { %v898_v17 = vrot.slane %v836_v15, %v4106_v30 }
 0x363   :  { %v899_v6 = vsel %vm498_vm2, %v898_v17, %v894_v11  ;;  %v851_v27 = vpop.permute.xlu0 %850 }
 0x364   :  { %v842_v42 = vpop.permute.xlu1 %841  ;;  %v921_v23 = vrot.slane %v851_v27, %v4091_v19  ;;  %v930_v25 = vsel %vm569_vm6, %v899_v6, %v929_v59 }
 0x365   :  { %v907_v63 = vrot.slane %v842_v42, %v4106_v30 }
 0x367   :  { %v908_v14 = vsel %vm498_vm2, %v907_v63, %v903_v1 }
 0x368   :  { %v848_v3 = vpop.permute.xlu1 %847  ;;  %v931_v37 = vsel %vm571_vm7, %v908_v14, %v930_v25 }
 0x369   :  { %v916_v60 = vrot.slane %v848_v3, %v4106_v30 }
 0x36b   :  { %v917_v43 = vsel %vm498_vm2, %v916_v60, %v912_v33 }
 0x36c   :  { %v854_v21 = vpop.permute.xlu1 %853  ;;  %v932_v8 = vsel %vm573_vm8, %v917_v43, %v931_v37 }
 0x36d   :  { %v925_v61 = vrot.slane %v854_v21, %v4106_v30 }
 0x36f   :  { %v926_v5 = vsel %vm498_vm2, %v925_v61, %v921_v23 }
 0x370   :  { %v933_v15 = vsel %vm575_vm9, %v926_v5, %v932_v8  ;;  %v1085_v16 = vpop.permute.xlu1 %1084 }
 0x371   :  { %v935_v49 = vsel %vm174_vm0, %v933_v15, 0.0 }
 0x372   :  { %936 = vadd.xlane.f32.xlu0 %v935_v49 }
 0x374   :  { %v1089_v55 = vpop.permute.xlu1 %1088 }
 0x378   :  { %v1092_v42 = vpop.permute.xlu1 %1091 }
 0x37c   :  { %v1096_v39 = vpop.permute.xlu1 %1095 }
 0x380   :  { %v1099_v29 = vpop.permute.xlu1 %1098 }
 0x384   :  { %v1103_v36 = vpop.permute.xlu1 %1102 }
 0x388   :  { %1109 = vbcast.lane.b32.xlu0 %v4286_v40, 264  ;;  %v1106_v9 = vpop.permute.xlu1 %1105 }
 0x38c   :  { %1133 = vbcast.lane.b32.xlu0 %v1074_v41, 256  ;;  %v1113_v63 = vpop.permute.xlu1 %1112 }
 0x390   :  { %v1117_v41 = vpop.permute.xlu1 %1116 }
 0x394   :  { %v1120_v13 = vpop.permute.xlu1 %1119 }
 0x398   :  { %v1124_v23 = vpop.permute.xlu1 %1123 }
 0x3ff   :  { %v937_v58 = vpop.xlane.xlu0 %936 }
 0x400   :  { %v942_v17 = vrot.slane %v937_v58, %v3958_v32  ;;  %v946_v10 = vrot.slane %v937_v58, %v4058_v38  ;;  %v950_v18 = vrot.slane %v937_v58, %v4051_v45  ;;  %v954_v40 = vrot.slane %v937_v58, %v4055_v22 }
 0x401   :  { %v958_v52 = vrot.slane %v937_v58, %v4062_v47  ;;  %v962_v1 = vrot.slane %v937_v58, %v4067_v51  ;;  %v966_v14 = vrot.slane %v937_v58, %v4073_v54 }
 0x402   :  { %3270 = vrcp.f32 %v942_v17 }
 0x403   :  { %3272 = vrcp.f32 %v946_v10  ;;  %v1110_v8 = vpop.permute.xlu0 %1109  ;;  %v3664_v10 = vmov 0.0|0.0  }
 0x404   :  { %3274 = vrcp.f32 %v950_v18 }
 0x405   :  { %3276 = vrcp.f32 %v954_v40 }
 0x406   :  { %3278 = vrcp.f32 %v958_v52  ;;  %v1310_v52 = vld [vmem:[#allocation13 + $0x8] sm:$0xff] }
 0x407   :  { %3280 = vrcp.f32 %v962_v1 }
 0x408   :  { %3282 = vrcp.f32 %v966_v14  ;;  %v3666_v14 = vmov 0.0  }
 0x40c   :  { %v3271_v11 = vpop.eup %3270 }
 0x40d   :  { %v3273_v3 = vpop.eup %3272  ;;  %v981_v12 = vmul.f32 %v3271_v11, %v4202_v48  ;;  %v980_v62 = vmul.f32 %v3271_v11, %v4205_v31  ;;  %v4362_v11 = vld [vmem:[#allocation7 + $0x10] sm:$0xff] }
 0x40e   :  { %v984_v6 = vmul.f32 %v3273_v3, %v4220_v46  ;;  %v983_v33 = vmul.f32 %v3273_v3, %v4213_v7  ;;  %v3275_v27 = vpop.eup %3274  ;;  %v970_v7 = vrot.slane %v937_v58, %v4080_v56  ;;  %v4352_v58 = vld [vmem:[#allocation7] sm:$0xff] }
 0x40f   :  { %v1156_v60 = vmul.f32 %v1089_v55, %v981_v12  ;;  %v1155_v4 = vmul.f32 %v1085_v16, %v980_v62  ;;  %v987_v31 = vmul.f32 %v3275_v27, %v4228_v35  ;;  %v986_v21 = vmul.f32 %v3275_v27, %v4211_v34  ;;  %v3277_v43 = vpop.eup %3276  ;;  %v1127_v55 = vpop.permute.xlu1 %1126  ;;  %3143 = vmatprep.mubr.msk.f32.mxu1 %vm174_vm0, %v4352_v58  ;;  %v4364_v12 = vld [vmem:[#allocation7 + $0x18] sm:$0xff] }
 0x410   :  { %v1158_v59 = vmul.f32 %v1096_v39, %v984_v6  ;;  %v1157_v48 = vmul.f32 %v1092_v42, %v983_v33  ;;  %v990_v46 = vmul.f32 %v3277_v43, %v4239_v53  ;;  %v989_v37 = vmul.f32 %v3277_v43, %v4217_v57  ;;  %v3279_v5 = vpop.eup %3278  ;;  %v1171_v53 = vld [vmem:[%s4892_s6] sm:$0xff]  ;;  %v1172_v57 = vld [vmem:[%s4892_s6 + $0x8] sm:$0xff]  ;;  %v4374_v33 = vld [vmem:[#allocation7 + $0x28] sm:$0xff] }
 0x411   :  { %1338 = vperm.xlu1 %3204, %v1156_v60   ;;  %1335 = vperm.xlu0 %3205, %v1155_v4   ;;  %v1160_v61 = vmul.f32 %v1103_v36, %v987_v31  ;;  %v1159_v25 = vmul.f32 %v1099_v29, %v986_v21  ;;  %3284 = vrcp.f32 %v970_v7  ;;  %v992_v15 = vmul.f32 %v3279_v5, %v4224_v28  ;;  %v3281_v16 = vpop.eup %3280  ;;  %v1134_v4 = vpop.permute.xlu0 %1133  ;;  %v4372_v6 = vld [vmem:[#allocation7 + $0x20] sm:$0xff] }
 0x412   :  { %v1162_v35 = vmul.f32 %v1110_v8, %v990_v46  ;;  %v1161_v34 = vmul.f32 %v1106_v9, %v989_v37  ;;  %v993_v49 = vmul.f32 %v3279_v5, %v4246_v2  ;;  %v3173_v42 = vpack.c.bf16 %v1172_v57, %v1171_v53  ;;  %v3283_v2 = vpop.eup %3282  ;;  %v4354_v9 = vld [vmem:[#allocation7 + $0x8] sm:$0xff] }
 0x413   :  { %v996_v39 = vmul.f32 %v3281_v16, %v4256_v24  ;;  %v1163_v29 = vmul.f32 %v1113_v63, %v992_v15  ;;  %v995_v28 = vmul.f32 %v3281_v16, %v4232_v44  ;;  %v1131_v17 = vpop.permute.xlu1 %1130  ;;  %v998_v18 = vmul.f32 %v3283_v2, %v4243_v50 }
 0x414   :  { %v1164_v36 = vmul.f32 %v1117_v41, %v993_v49  ;;  %3174 = vmatprep.subr.bf16.mxu1 %v3173_v42  ;;  %v999_v44 = vmul.f32 %v3283_v2, %v4260_v20  ;;  %v1309_v41 = vld [vmem:[#allocation13] sm:$0xff] }
 0x415   :  { %1344 = vperm.xlu1 %3204, %v1158_v59   ;;  %1341 = vperm.xlu0 %3205, %v1157_v48   ;;  %v1166_v24 = vmul.f32 %v1124_v23, %v996_v39  ;;  %v1165_v63 = vmul.f32 %v1120_v13, %v995_v28  ;;  %v3178_v3 = vpack.c.bf16 %v1310_v52, %v1309_v41  ;;  %v4382_v13 = vld [vmem:[#allocation7 + $0x38] sm:$0xff] }
 0x416   :  { %3176 = vmatpush3.bf16.msra.mxu1 %v3173_v42  ;;  %v1167_v50 = vmul.f32 %v1127_v55, %v998_v18  ;;  %v1168_v62 = vmul.f32 %v1131_v17, %v999_v44 }
 0x417   :  { %3177 = vmatprep.subr.bf16.mxu1 %v3664_v10  ;;  %v1138_v60 = vpop.permute.xlu1 %1137 }
 0x419   :  { %1350 = vperm.xlu1 %3204, %v1160_v61   ;;  %1347 = vperm.xlu0 %3205, %v1159_v25  }
 0x41a   :  { %3144 = vmatmul.mubr.msk.f32.vlgmr.msra.gmra.mrb[2].mxu1 %vm174_vm0, %v4354_v9 }
 0x41b   :  { %v3285_v40 = vpop.eup %3284  ;;  %3146 = vmatprep.mubr.msk.f32.mxu1 %vm174_vm0, %v4362_v11  ;;  %3179 = vmatpush3.bf16.msra.mxu1 %v3178_v3 }
 0x41c   :  { %v1002_v20 = vmul.f32 %v3285_v40, %v4271_v26  ;;  %v1001_v1 = vmul.f32 %v3285_v40, %v4250_v0  ;;  %3180 = vmatprep.subr.bf16.mxu1 %v3664_v10  ;;  %v4380_v0 = vld [vmem:[#allocation7 + $0x30] sm:$0xff] }
 0x41d   :  { %1353 = vperm.xlu0 %3205, %v1161_v34   ;;  %1356 = vperm.xlu1 %3204, %v1162_v35  }
 0x41e   :  { %3147 = vmatmul.mubr.msk.f32.gmra.mrb[4].mxu1 %vm174_vm0, %v4364_v12  ;;  %v1170_v27 = vmul.f32 %v1138_v60, %v1002_v20  ;;  %v1169_v26 = vmul.f32 %v1134_v4, %v1001_v1 }
 0x41f   :  { %3149 = vmatprep.mubr.msk.f32.mxu1 %vm174_vm0, %v4372_v6 }
 0x421   :  { %1359 = vperm.xlu0 %3205, %v1163_v29   ;;  %1362 = vperm.xlu1 %3204, %v1164_v36  }
 0x422   :  { %3150 = vmatmul.mubr.msk.f32.gmra.mrb[6].mxu1 %vm174_vm0, %v4374_v33 }
 0x423   :  { %3152 = vmatprep.mubr.msk.f32.mxu1 %vm174_vm0, %v4380_v0 }
 0x425   :  { %1365 = vperm.xlu0 %3205, %v1165_v63   ;;  %1368 = vperm.xlu1 %3204, %v1166_v24  }
 0x426   :  { %3153 = vmatmul.mubr.msk.f32.gmra.mrb[8].mxu1 %vm174_vm0, %v4382_v13 }
 0x427   :  { %3159 = vmatprep.mubr.msk.f32.mxu1 %vm3665_vm10, %v3666_v14 }
 0x429   :  { %1371 = vperm.xlu0 %3205, %v1167_v50   ;;  %1374 = vperm.xlu1 %3204, %v1168_v62  }
 0x42d   :  { %1380 = vperm.xlu1 %3204, %v1170_v27   ;;  %1377 = vperm.xlu0 %3205, %v1169_v26  }
 0x490   :  { %v1339_v59 = vpop.permute.xlu1 %1338  ;;  %v1336_v48 = vpop.permute.xlu0 %1335 }
 0x491   :  { %v1389_v49 = vrot.slane %v1339_v59, %v4106_v30  ;;  %v1385_v16 = vrot.slane %v1336_v48, %v4091_v19 }
 0x493   :  { %v1390_v10 = vsel %vm498_vm2, %v1389_v49, %v1385_v16 }
 0x494   :  { %v1345_v31 = vpop.permute.xlu1 %1344  ;;  %v1342_v21 = vpop.permute.xlu0 %1341 }
 0x495   :  { %v1398_v37 = vrot.slane %v1345_v31, %v4106_v30  ;;  %v1394_v5 = vrot.slane %v1342_v21, %v4091_v19 }
 0x497   :  { %v1399_v39 = vsel %vm498_vm2, %v1398_v37, %v1394_v5  ;;  %v3667_v37 = vmov 1966171168  }
 0x498   :  { %v1351_v43 = vpop.permute.xlu1 %1350  ;;  %v1348_v23 = vpop.permute.xlu0 %1347  ;;  %v1454_v63 = vsel %vm563_vm3, %v1399_v39, %v1390_v10  ;;  %v1536_v5 = vunpack.c.l.s4 %v3667_v37 }
 0x499   :  { %v1407_v8 = vrot.slane %v1351_v43, %v4106_v30  ;;  %v1403_v35 = vrot.slane %v1348_v23, %v4091_v19 }
 0x49b   :  { %v1408_v28 = vsel %vm498_vm2, %v1407_v8, %v1403_v35  ;;  %v1537_v8 = vunpack.c.0.s8 %v1536_v5  ;;  %v3071_v35 = vld [vmem:[#allocation15] ss:$0 sm:$0xff]  ;;  %v4442_v5 = vld [vmem:[%s4898_s12] sm:$0x7]  ;;  %s3073_s12 = sld [smem:[#allocation3 + $0x1]] }
 0x49c   :  { %v1357_v7 = vpop.permute.xlu1 %1356  ;;  %v1354_v46 = vpop.permute.xlu0 %1353  ;;  %v1455_v41 = vsel %vm565_vm4, %v1408_v28, %v1454_v63 }
 0x49d   :  { %v1416_v55 = vrot.slane %v1357_v7, %v4106_v30  ;;  %v1412_v53 = vrot.slane %v1354_v46, %v4091_v19 }
 0x49f   :  { %v1417_v24 = vsel %vm498_vm2, %v1416_v55, %v1412_v53  ;;  %v3062_v53 = vld [vmem:[#allocation12] ss:$0 sm:$0xff] }
 0x4a0   :  { %v1363_v61 = vpop.permute.xlu1 %1362  ;;  %v1360_v25 = vpop.permute.xlu0 %1359  ;;  %v1456_v3 = vsel %vm567_vm5, %v1417_v24, %v1455_v41 }
 0x4a1   :  { %v1425_v57 = vrot.slane %v1363_v61, %v4106_v30  ;;  %v1421_v42 = vrot.slane %v1360_v25, %v4091_v19 }
 0x4a3   :  { %v1426_v40 = vsel %vm498_vm2, %v1425_v57, %v1421_v42 }
 0x4a4   :  { %v1369_v34 = vpop.permute.xlu1 %1368  ;;  %v1366_v15 = vpop.permute.xlu0 %1365  ;;  %v1457_v1 = vsel %vm569_vm6, %v1426_v40, %v1456_v3 }
 0x4a5   :  { %v1434_v29 = vrot.slane %v1369_v34, %v4106_v30  ;;  %v1430_v36 = vrot.slane %v1366_v15, %v4091_v19  ;;  %v4938_v34 = vld [vmem:[#allocation29_spill] sm:$0xff] }
 0x4a6   :  { %v4423_v15 = vsub.s32 %v1537_v8, %v4938_v34  ;;  %v1642_v8 = vrot.slane %v4442_v5, %v4058_v38 }
 0x4a7   :  { %v1435_v52 = vsel %vm498_vm2, %v1434_v29, %v1430_v36 }
 0x4a8   :  { %v1375_v2 = vpop.permute.xlu1 %1374  ;;  %v1372_v17 = vpop.permute.xlu0 %1371  ;;  %v1458_v27 = vsel %vm571_vm7, %v1435_v52, %v1457_v1 }
 0x4a9   :  { %v1443_v18 = vrot.slane %v1375_v2, %v4106_v30  ;;  %v1439_v44 = vrot.slane %v1372_v17, %v4091_v19 }
 0x4ab   :  { %v1444_v50 = vsel %vm498_vm2, %v1443_v18, %v1439_v44 }
 0x4ac   :  { %v1381_v62 = vpop.permute.xlu1 %1380  ;;  %v1378_v20 = vpop.permute.xlu0 %1377  ;;  %v1459_v26 = vsel %vm573_vm8, %v1444_v50, %v1458_v27 }
 0x4ad   :  { %v1452_v60 = vrot.slane %v1381_v62, %v4106_v30  ;;  %v1448_v4 = vrot.slane %v1378_v20, %v4091_v19 }
 0x4af   :  { %v1453_v59 = vsel %vm498_vm2, %v1452_v60, %v1448_v4 }
 0x4b0   :  { %v1460_v48 = vsel %vm575_vm9, %v1453_v59, %v1459_v26 }
 0x4b1   :  { %3160 = vmatmul.mubr.msk.f32.vlgmr.msra.gmra.mrb[10].mxu1 %vm174_vm0, %v1460_v48 }
 0x4b2   :  { %3166 = vmatprep.mubr.msk.f32.mxu1 %vm3665_vm10, %v3666_v14 }
 0x4ed   :  { %v3145_v31 = vpop.f32.mrb[2].mxu1 }
 0x4ee   :  { %v1270_v21 = vpop.f32.mrb[3].mxu1  ;;  %v1276_v36 = vadd.f32 %v3145_v31, %v3062_v53 }
 0x4ef   :  { %v1271_v28 = vadd.f32 %v3062_v53, %v1270_v21 }
 0x4f1   :  { %v3148_v43 = vpop.f32.mrb[4].mxu1 }
 0x4f2   :  { %v1280_v23 = vpop.f32.mrb[5].mxu1  ;;  %v1286_v2 = vadd.f32 %v3148_v43, %v3062_v53 }
 0x4f3   :  { %v1281_v17 = vadd.f32 %v3062_v53, %v1280_v23 }
 0x4f5   :  { %v3151_v7 = vpop.f32.mrb[6].mxu1 }
 0x4f6   :  { %v1290_v46 = vpop.f32.mrb[7].mxu1  ;;  %v1296_v63 = vadd.f32 %v3151_v7, %v3062_v53 }
 0x4f7   :  { %v1291_v40 = vadd.f32 %v3062_v53, %v1290_v46 }
 0x4f9   :  { %v3154_v61 = vpop.f32.mrb[8].mxu1 }
 0x4fa   :  { %v1300_v25 = vpop.f32.mrb[9].mxu1  ;;  %v1306_v41 = vadd.f32 %v3154_v61, %v3062_v53 }
 0x4fb   :  { %v1301_v1 = vadd.f32 %v3062_v53, %v1300_v25 }
 0x584   :  { %v1529_v49 = vpop.f32.mrb[10].mxu1 }
 0x585   :  { %v1530_v16 = vadd.f32 %v3071_v35, %v1529_v49  ;;  %v3161_v55 = vpop.f32.mrb[11].mxu1 }
 0x587   :  { %v1534_v14 = vcombine.high %v1530_v16, %v1530_v16  ;;  %v1541_v57 = vrot.slane %v1530_v16, %v4423_v15 }
 0x589   :  { %v1548_v42 = vrot.slane %v1534_v14, %v4423_v15  ;;  %v1549_v39 = vcombine.high %v1541_v57, %v1541_v57  ;;  %v1557_v29 = vrot.slane %v1541_v57, %v4423_v15 }
 0x58b   :  { %v1550_v10 = vcombine.high %v1548_v42, %v1548_v42  ;;  %v1564_v24 = vrot.slane %v1548_v42, %v4423_v15  ;;  %v1571_v18 = vrot.slane %v1549_v39, %v4423_v15  ;;  %v1579_v44 = vcombine.high %v1557_v29, %v1557_v29 }
 0x58c   :  { %v1586_v52 = vrot.slane %v1557_v29, %v3958_v32 }
 0x58d   :  { %v1578_v3 = vrot.slane %v1550_v10, %v4423_v15  ;;  %v1580_v50 = vcombine.high %v1564_v24, %v1564_v24  ;;  %v1581_v62 = vcombine.high %v1571_v18, %v1571_v18  ;;  %v1590_v20 = vrot.slane %v1571_v18, %v3958_v32 }
 0x58e   :  { %v1594_v60 = vrot.slane %v1579_v44, %v3958_v32  ;;  %v1602_v4 = vrot.slane %v1564_v24, %v3958_v32  ;;  %v1623_v27 = vadd.f32 %v1586_v52, %v1271_v28 }
 0x58f   :  { %v1582_v26 = vcombine.high %v1578_v3, %v1578_v3  ;;  %v1598_v59 = vrot.slane %v1581_v62, %v3958_v32  ;;  %v1606_v48 = vrot.slane %v1578_v3, %v3958_v32  ;;  %v1610_v31 = vrot.slane %v1580_v50, %v3958_v32 }
 0x590   :  { %v1624_v21 = vadd.f32 %v1590_v20, %v1276_v36  ;;  %v1625_v43 = vadd.f32 %v1594_v60, %v1281_v17  ;;  %v1627_v23 = vadd.f32 %v1602_v4, %v1291_v40  ;;  %3286 = vtanh.f32 %v1623_v27 }
 0x591   :  { %v1614_v7 = vrot.slane %v1582_v26, %v3958_v32  ;;  %v1626_v46 = vadd.f32 %v1598_v59, %v1286_v2  ;;  %v1628_v61 = vadd.f32 %v1606_v48, %v1296_v63  ;;  %v1629_v25 = vadd.f32 %v1610_v31, %v1301_v1 }
 0x592   :  { %3288 = vtanh.f32 %v1624_v21  ;;  %v1676_v50 = vstv %s3073_s12 }
 0x593   :  { %3290 = vtanh.f32 %v1625_v43  ;;  %v1630_v37 = vadd.f32 %v1614_v7, %v1306_v41 }
 0x594   :  { %3292 = vtanh.f32 %v1626_v46 }
 0x595   :  { %3294 = vtanh.f32 %v1627_v23 }
 0x596   :  { %3296 = vtanh.f32 %v1629_v25 }
 0x597   :  { %3298 = vtanh.f32 %v1628_v61 }
 0x598   :  { %3300 = vtanh.f32 %v1630_v37 }
 0x59a   :  { %v3287_v35 = vpop.eup %3286 }
 0x59b   :  { %v1643_v34 = vmul.f32 %v3287_v35, %v1642_v8 }
 0x59c   :  { %v3289_v49 = vpop.eup %3288 }
 0x59d   :  { %v3291_v16 = vpop.eup %3290  ;;  %v1651_v55 = vsel %vm404_vm1, %v1643_v34, 0.0  ;;  %v1644_v53 = vmul.f32 %v3289_v49, %v1642_v8 }
 0x59e   :  { %v3293_v14 = vpop.eup %3292  ;;  %1652 = vadd.xlane.f32.xlu0 %v1651_v55  ;;  %v1645_v57 = vmul.f32 %v3291_v16, %v1642_v8 }
 0x59f   :  { %v3295_v42 = vpop.eup %3294  ;;  %v1654_v39 = vsel %vm404_vm1, %v1644_v53, 0.0  ;;  %v1646_v2 = vmul.f32 %v3293_v14, %v1642_v8 }
 0x5a0   :  { %1655 = vadd.xlane.f32.xlu1 %v1654_v39  ;;  %v1647_v29 = vmul.f32 %v3295_v42, %v1642_v8  ;;  %v3297_v36 = vpop.eup %3296  ;;  %v1657_v28 = vsel %vm404_vm1, %v1645_v57, 0.0 }
 0x5a1   :  { %v3299_v17 = vpop.eup %3298  ;;  %v1649_v24 = vmul.f32 %v3297_v36, %v1642_v8  ;;  %v1660_v18 = vsel %vm404_vm1, %v1646_v2, 0.0 }
 0x5a2   :  { %1658 = vadd.xlane.f32.xlu0 %v1657_v28  ;;  %v1663_v10 = vsel %vm404_vm1, %v1647_v29, 0.0  ;;  %v1648_v44 = vmul.f32 %v3299_v17, %v1642_v8  ;;  %v3301_v63 = vpop.eup %3300 }
 0x5a3   :  { %v1669_v40 = vsel %vm404_vm1, %v1649_v24, 0.0  ;;  %v1650_v52 = vmul.f32 %v3301_v63, %v1642_v8 }
 0x5a4   :  { %1664 = vadd.xlane.f32.xlu1 %v1663_v10  ;;  %v1666_v41 = vsel %vm404_vm1, %v1648_v44, 0.0 }
 0x5a5   :  { %v1672_v3 = vsel %vm404_vm1, %v1650_v52, 0.0 }
 0x5a6   :  { %1661 = vadd.xlane.f32.xlu0 %v1660_v18 }
 0x5a8   :  { %1670 = vadd.xlane.f32.xlu1 %v1669_v40 }
 0x5aa   :  { %1667 = vadd.xlane.f32.xlu0 %v1666_v41 }
 0x5ae   :  { %1673 = vadd.xlane.f32.xlu0 %v1672_v3 }
 0x62b   :  { %v1653_v62 = vpop.xlane.xlu0 %1652 }
 0x62c   :  { %v1677_v1 = vadd.f32 %v1676_v50, %v1653_v62 }
 0x62d   :  { %v1656_v20 = vpop.xlane.xlu1 %1655 }
 0x62e   :  { %v1678_v60 = vadd.f32 %v1676_v50, %v1656_v20  ;;  %v1696_v48 = vrot.slane %v1677_v1, %v4091_v19 }
 0x62f   :  { %v1659_v4 = vpop.xlane.xlu0 %1658 }
 0x630   :  { %v1700_v27 = vrot.slane %v1678_v60, %v4091_v19  ;;  %v1679_v26 = vadd.f32 %v1676_v50, %v1659_v4 }
 0x631   :  { %v1665_v59 = vpop.xlane.xlu1 %1664 }
 0x632   :  { %v1704_v31 = vrot.slane %v1679_v26, %v4091_v19  ;;  %v1725_v43 = vsel %vm563_vm3, %v1700_v27, %v1696_v48  ;;  %v1681_v7 = vadd.f32 %v1676_v50, %v1665_v59 }
 0x633   :  { %v1662_v21 = vpop.xlane.xlu0 %1661 }
 0x634   :  { %v1680_v23 = vadd.f32 %v1676_v50, %v1662_v21  ;;  %v1726_v25 = vsel %vm565_vm4, %v1704_v31, %v1725_v43  ;;  %v1712_v34 = vrot.slane %v1681_v7, %v4091_v19 }
 0x635   :  { %v1671_v61 = vpop.xlane.xlu1 %1670 }
 0x636   :  { %v1708_v46 = vrot.slane %v1680_v23, %v4091_v19  ;;  %v1683_v49 = vadd.f32 %v1676_v50, %v1671_v61 }
 0x637   :  { %v1668_v37 = vpop.xlane.xlu0 %1667 }
 0x638   :  { %v1727_v8 = vsel %vm567_vm5, %v1708_v46, %v1726_v25  ;;  %v1682_v35 = vadd.f32 %v1676_v50, %v1668_v37  ;;  %v1720_v42 = vrot.slane %v1683_v49, %v4091_v19 }
 0x639   :  { %v1728_v53 = vsel %vm569_vm6, %v1712_v34, %v1727_v8 }
 0x63a   :  { %v1716_v16 = vrot.slane %v1682_v35, %v4091_v19 }
 0x63b   :  { %v1674_v55 = vpop.xlane.xlu0 %1673 }
 0x63c   :  { %v1684_v14 = vadd.f32 %v1676_v50, %v1674_v55  ;;  %v1729_v57 = vsel %vm571_vm7, %v1716_v16, %v1728_v53 }
 0x63d   :  { %v1730_v29 = vsel %vm573_vm8, %v1720_v42, %v1729_v57 }
 0x63e   :  { %v1724_v39 = vrot.slane %v1684_v14, %v4091_v19 }
 0x640   :  { %v1731_v36 = vsel %vm575_vm9, %v1724_v39, %v1730_v29 }
 0x641   :  { %v1734_v28 = vsel %vm1733_vm11, %v1731_v36, -inf }
 0x642   :  { %1735 = vmax.xlane.f32.xlu1 %v1734_v28 }
 0x6cf   :  { %v1736_v2 = vpop.xlane.xlu1 %1735 }
 0x6d0   :  { %v1741_v17 = vrot.slane %v1736_v2, %v3958_v32  ;;  %v1745_v10 = vrot.slane %v1736_v2, %v4058_v38  ;;  %v1749_v24 = vrot.slane %v1736_v2, %v4051_v45  ;;  %v1753_v18 = vrot.slane %v1736_v2, %v4055_v22 }
 0x6d1   :  { %v1761_v44 = vrot.slane %v1736_v2, %v4067_v51  ;;  %v1757_v52 = vrot.slane %v1736_v2, %v4062_v47  ;;  %v1769_v20 = vrot.slane %v1736_v2, %v4080_v56  ;;  %v1765_v59 = vrot.slane %v1736_v2, %v4073_v54 }
 0x6d2   :  { %v1778_v63 = vsub.f32 %v1677_v1, %v1741_v17  ;;  %v1779_v40 = vsub.f32 %v1678_v60, %v1745_v10  ;;  %v1781_v41 = vsub.f32 %v1680_v23, %v1753_v18  ;;  %v1780_v3 = vsub.f32 %v1679_v26, %v1749_v24 }
 0x6d3   :  { %v1783_v4 = vsub.f32 %v1682_v35, %v1761_v44  ;;  %v1782_v48 = vsub.f32 %v1681_v7, %v1757_v52  ;;  %v1785_v21 = vsub.f32 %v1684_v14, %v1769_v20  ;;  %v1784_v60 = vsub.f32 %v1683_v49, %v1765_v59 }
 0x6d4   :  { %v1786_v50 = vmul.f32 1.442695, %v1778_v63  ;;  %v1788_v62 = vmul.f32 1.442695, %v1779_v40  ;;  %v1792_v27 = vmul.f32 1.442695, %v1781_v41 }
 0x6d5   :  { %v1790_v31 = vmul.f32 1.442695, %v1780_v3  ;;  %v1796_v1 = vmul.f32 1.442695, %v1783_v4  ;;  %v1794_v43 = vmul.f32 1.442695, %v1782_v48 }
 0x6d6   :  { %3302 = vpow2.f32 %v1786_v50  ;;  %v1800_v26 = vmul.f32 1.442695, %v1785_v21  ;;  %v1798_v23 = vmul.f32 1.442695, %v1784_v60 }
 0x6d7   :  { %3304 = vpow2.f32 %v1788_v62 }
 0x6d8   :  { %3306 = vpow2.f32 %v1792_v27 }
 0x6d9   :  { %3308 = vpow2.f32 %v1790_v31 }
 0x6da   :  { %3310 = vpow2.f32 %v1796_v1 }
 0x6db   :  { %3312 = vpow2.f32 %v1794_v43 }
 0x6dc   :  { %3314 = vpow2.f32 %v1800_v26 }
 0x6dd   :  { %3316 = vpow2.f32 %v1798_v23 }
 0x6e0   :  { %v3303_v46 = vpop.eup %3302 }
 0x6e1   :  { %v3305_v61 = vpop.eup %3304  ;;  %1811 = vperm.xlu0 %3205, %v3303_v46  }
 0x6e2   :  { %1814 = vperm.xlu1 %3204, %v3305_v61   ;;  %v4478_v25 = vpop.eup %3306 }
 0x6e3   :  { %v3309_v7 = vpop.eup %3308 }
 0x6e4   :  { %v4481_v37 = vpop.eup %3310 }
 0x6e5   :  { %1820 = vperm.xlu0 %3205, %v4478_v25   ;;  %v3313_v8 = vpop.eup %3312 }
 0x6e6   :  { %1817 = vperm.xlu1 %3204, %v3309_v7   ;;  %v4484_v35 = vpop.eup %3314 }
 0x6e7   :  { %v4486_v34 = vpop.eup %3316 }
 0x6e9   :  { %1826 = vperm.xlu0 %3205, %v4481_v37  }
 0x6ea   :  { %1823 = vperm.xlu1 %3204, %v3313_v8  }
 0x6ed   :  { %1832 = vperm.xlu0 %3205, %v4484_v35  }
 0x6ee   :  { %1829 = vperm.xlu1 %3204, %v4486_v34  }
 0x760   :  { %v1812_v49 = vpop.permute.xlu0 %1811 }
 0x761   :  { %v1815_v16 = vpop.permute.xlu1 %1814  ;;  %v1837_v53 = vrot.slane %v1812_v49, %v4091_v19 }
 0x762   :  { %v1841_v55 = vrot.slane %v1815_v16, %v4091_v19 }
 0x764   :  { %v1821_v14 = vpop.permute.xlu0 %1820  ;;  %v1866_v39 = vsel %vm563_vm3, %v1841_v55, %v1837_v53 }
 0x765   :  { %v1818_v57 = vpop.permute.xlu1 %1817  ;;  %v1849_v29 = vrot.slane %v1821_v14, %v4091_v19 }
 0x766   :  { %v1845_v42 = vrot.slane %v1818_v57, %v4091_v19 }
 0x768   :  { %v1867_v36 = vsel %vm565_vm4, %v1845_v42, %v1866_v39  ;;  %v1827_v28 = vpop.permute.xlu0 %1826 }
 0x769   :  { %v1824_v2 = vpop.permute.xlu1 %1823  ;;  %v1868_v10 = vsel %vm567_vm5, %v1849_v29, %v1867_v36  ;;  %v1857_v24 = vrot.slane %v1827_v28, %v4091_v19 }
 0x76a   :  { %v1853_v17 = vrot.slane %v1824_v2, %v4091_v19 }
 0x76c   :  { %v1869_v18 = vsel %vm569_vm6, %v1853_v17, %v1868_v10  ;;  %v1833_v44 = vpop.permute.xlu0 %1832 }
 0x76d   :  { %v1830_v63 = vpop.permute.xlu1 %1829  ;;  %v1865_v40 = vrot.slane %v1833_v44, %v4091_v19  ;;  %v1870_v52 = vsel %vm571_vm7, %v1857_v24, %v1869_v18 }
 0x76e   :  { %v1861_v41 = vrot.slane %v1830_v63, %v4091_v19 }
 0x770   :  { %v1871_v3 = vsel %vm573_vm8, %v1861_v41, %v1870_v52 }
 0x771   :  { %v1872_v50 = vsel %vm575_vm9, %v1865_v40, %v1871_v3 }
 0x772   :  { %v1874_v62 = vsel %vm1733_vm11, %v1872_v50, 0.0 }
 0x773   :  { %1875 = vadd.xlane.f32.xlu1 %v1874_v62 }
 0x800   :  { %v1876_v20 = vpop.xlane.xlu1 %1875 }
 0x801   :  { %v1881_v4 = vrot.slane %v1876_v20, %v3958_v32  ;;  %v1885_v27 = vrot.slane %v1876_v20, %v4058_v38  ;;  %v1889_v59 = vrot.slane %v1876_v20, %v4051_v45  ;;  %v1893_v48 = vrot.slane %v1876_v20, %v4055_v22 }
 0x802   :  { %v1897_v21 = vrot.slane %v1876_v20, %v4062_v47  ;;  %v1901_v43 = vrot.slane %v1876_v20, %v4067_v51  ;;  %v1905_v49 = vrot.slane %v1876_v20, %v4073_v54  ;;  %v1909_v53 = vrot.slane %v1876_v20, %v4080_v56 }
 0x803   :  { %3318 = vrcp.f32 %v1881_v4 }
 0x804   :  { %3320 = vrcp.f32 %v1885_v27 }
 0x805   :  { %3322 = vrcp.f32 %v1889_v59 }
 0x806   :  { %3324 = vrcp.f32 %v1893_v48 }
 0x807   :  { %3326 = vrcp.f32 %v1897_v21 }
 0x808   :  { %3328 = vrcp.f32 %v1901_v43 }
 0x809   :  { %3330 = vrcp.f32 %v1905_v49 }
 0x80a   :  { %3332 = vrcp.f32 %v1909_v53 }
 0x80d   :  { %v3319_v31 = vpop.eup %3318 }
 0x80e   :  { %v1919_v1 = vmul.f32 %v3319_v31, %v3303_v46  ;;  %v3321_v60 = vpop.eup %3320 }
 0x80f   :  { %v1921_v26 = vmul.f32 %v3321_v60, %v3305_v61  ;;  %v3323_v23 = vpop.eup %3322 }
 0x810   :  { %1936 = vperm.xlu0 %3205, %v1919_v1   ;;  %v1923_v16 = vmul.f32 %v3323_v23, %v3309_v7  ;;  %v3325_v55 = vpop.eup %3324 }
 0x811   :  { %v1925_v14 = vmul.f32 %v3325_v55, %v4478_v25  ;;  %v3327_v46 = vpop.eup %3326  ;;  %v2038_v25 = vld [vmem:[%s4896_s10] sm:$0xff] }
 0x812   :  { %v1927_v57 = vmul.f32 %v3327_v46, %v3313_v8  ;;  %v3329_v42 = vpop.eup %3328  ;;  %v2039_v8 = vld [vmem:[%s4896_s10 + $0x8] sm:$0xff] }
 0x813   :  { %v1929_v61 = vmul.f32 %v3329_v42, %v4481_v37  ;;  %v3331_v39 = vpop.eup %3330  ;;  %v3181_v28 = vpack.c.bf16 %v2039_v8, %v2038_v25 }
 0x814   :  { %1941 = vperm.xlu0 %3205, %v1921_v26   ;;  %v1931_v29 = vmul.f32 %v3331_v39, %v4486_v34  ;;  %v3333_v7 = vpop.eup %3332 }
 0x815   :  { %v1933_v36 = vmul.f32 %v3333_v7, %v4484_v35  ;;  %3182 = vmatpush3.bf16.msra.mxu1 %v3181_v28 }
 0x818   :  { %1946 = vperm.xlu0 %3205, %v1923_v16  }
 0x81c   :  { %1951 = vperm.xlu0 %3205, %v1925_v14  }
 0x820   :  { %1956 = vperm.xlu0 %3205, %v1927_v57  }
 0x824   :  { %1961 = vperm.xlu0 %3205, %v1929_v61  }
 0x828   :  { %1966 = vperm.xlu0 %3205, %v1931_v29  }
 0x82c   :  { %1971 = vperm.xlu0 %3205, %v1933_v36  }
 0x88f   :  { %v1937_v37 = vpop.permute.xlu0 %1936 }
 0x890   :  { %v1974_v10 = vmul.f32 %v1937_v37, %v4352_v58 }
 0x892   :  { %v1982_v63 = vsel %vm174_vm0, %v1974_v10, 0.0 }
 0x893   :  { %v1942_v2 = vpop.permute.xlu0 %1941  ;;  %v1983_v50 = vrot.slane %v1982_v63, 4 }
 0x894   :  { %v1975_v17 = vmul.f32 %v1942_v2, %v4354_v9 }
 0x895   :  { %v1984_v27 = vadd.f32 %v1983_v50, %v1982_v63 }
 0x896   :  { %v1989_v24 = vsel %vm174_vm0, %v1975_v17, 0.0 }
 0x897   :  { %v1947_v34 = vpop.permute.xlu0 %1946  ;;  %v1990_v41 = vrot.slane %v1989_v24, 4  ;;  %v1985_v26 = vrot.slane %v1984_v27, 2 }
 0x898   :  { %v1976_v35 = vmul.f32 %v1947_v34, %v4362_v11 }
 0x899   :  { %v1991_v20 = vadd.f32 %v1990_v41, %v1989_v24  ;;  %v1986_v42 = vadd.f32 %v1985_v26, %v1984_v27 }
 0x89a   :  { %v1996_v18 = vsel %vm174_vm0, %v1976_v35, 0.0 }
 0x89b   :  { %v1952_v44 = vpop.permute.xlu0 %1951  ;;  %v1997_v52 = vrot.slane %v1996_v18, 4 }
 0x89c   :  { %v1977_v40 = vmul.f32 %v1952_v44, %v4364_v12  ;;  %v1992_v12 = vrot.slane %v1991_v20, 2 }
 0x89d   :  { %v1998_v11 = vadd.f32 %v1997_v52, %v1996_v18 }
 0x89e   :  { %v2003_v3 = vsel %vm174_vm0, %v1977_v40, 0.0  ;;  %v1993_v53 = vadd.f32 %v1992_v12, %v1991_v20 }
 0x89f   :  { %v2004_v9 = vrot.slane %v2003_v3, 4  ;;  %v1957_v62 = vpop.permute.xlu0 %1956  ;;  %v1999_v60 = vrot.slane %v1998_v11, 2 }
 0x8a0   :  { %v1978_v58 = vmul.f32 %v1957_v62, %v4372_v6  ;;  %v1994_v25 = vrot.slane %v1993_v53, 1 }
 0x8a1   :  { %v2005_v59 = vadd.f32 %v2004_v9, %v2003_v3  ;;  %v2000_v46 = vadd.f32 %v1999_v60, %v1998_v11 }
 0x8a2   :  { %v2010_v4 = vsel %vm174_vm0, %v1978_v58, 0.0  ;;  %v1995_v24 = vadd.f32 %v1994_v25, %v1993_v53 }
 0x8a3   :  { %v2011_v48 = vrot.slane %v2010_v4, 4  ;;  %v1962_v31 = vpop.permute.xlu0 %1961  ;;  %v2006_v23 = vrot.slane %v2005_v59, 2  ;;  %v2001_v37 = vrot.slane %v2000_v46, 1 }
 0x8a4   :  { %v1979_v21 = vmul.f32 %v1962_v31, %v4374_v33 }
 0x8a5   :  { %v2012_v1 = vadd.f32 %v2011_v48, %v2010_v4  ;;  %v2007_v61 = vadd.f32 %v2006_v23, %v2005_v59  ;;  %v2002_v40 = vadd.f32 %v2001_v37, %v2000_v46 }
 0x8a6   :  { %v2017_v43 = vsel %vm174_vm0, %v1979_v21, 0.0 }
 0x8a7   :  { %v2018_v49 = vrot.slane %v2017_v43, 4  ;;  %v1967_v16 = vpop.permute.xlu0 %1966  ;;  %v2013_v6 = vrot.slane %v2012_v1, 2  ;;  %v2008_v17 = vrot.slane %v2007_v61, 1 }
 0x8a8   :  { %v1980_v55 = vmul.f32 %v1967_v16, %v4380_v0  ;;  %v1987_v0 = vrot.slane %v1986_v42, 1 }
 0x8a9   :  { %v2019_v14 = vadd.f32 %v2018_v49, %v2017_v43  ;;  %v2014_v7 = vadd.f32 %v2013_v6, %v2012_v1  ;;  %v2009_v52 = vadd.f32 %v2008_v17, %v2007_v61  ;;  %v3074_v1 = vld [vmem:[%s4897_s11] ss:$0 sm:$0xff]  ;;  %s3668_s11 = smov 32  }
 0x8aa   :  { %v2024_v57 = vsel %vm174_vm0, %v1980_v55, 0.0  ;;  %v1988_v41 = vadd.f32 %v1987_v0, %v1986_v42 }
 0x8ab   :  { %v2020_v33 = vrot.slane %v2019_v14, 2  ;;  %v2025_v39 = vrot.slane %v2024_v57, 4  ;;  %v1972_v29 = vpop.permute.xlu0 %1971  ;;  %v2015_v35 = vrot.slane %v2014_v7, 1 }
 0x8ac   :  { %v1981_v36 = vmul.f32 %v1972_v29, %v4382_v13  ;;  %v2055_v9 = vsel %vm563_vm3, %v1995_v24, %v1988_v41  ;;  %v2275_v29 = vrot.slane %v4442_v5, %v4051_v45  ;;  %v4939_v5 = vld [vmem:[#allocation28_spill] sm:$0xff]  ;;  %v4943_v41 = vld [vmem:[#allocation33_spill] sm:$0xff] }
 0x8ad   :  { %v2021_v8 = vadd.f32 %v2020_v33, %v2019_v14  ;;  %v2026_v28 = vadd.f32 %v2025_v39, %v2024_v57  ;;  %v2016_v50 = vadd.f32 %v2015_v35, %v2014_v7  ;;  %v2056_v20 = vsel %vm565_vm4, %v2002_v40, %v2055_v9 }
 0x8ae   :  { %v2031_v2 = vsel %vm174_vm0, %v1981_v36, 0.0  ;;  %v2057_v4 = vsel %vm567_vm5, %v2009_v52, %v2056_v20  ;;  %v4946_v20 = vld [vmem:[#allocation36_spill] sm:$0xff] }
 0x8af   :  { %v2027_v34 = vrot.slane %v2026_v28, 2  ;;  %v2032_v10 = vrot.slane %v2031_v2, 4  ;;  %v2022_v18 = vrot.slane %v2021_v8, 1  ;;  %v2058_v59 = vsel %vm569_vm6, %v2016_v50, %v2057_v4 }
 0x8b1   :  { %v2028_v44 = vadd.f32 %v2027_v34, %v2026_v28  ;;  %v2033_v63 = vadd.f32 %v2032_v10, %v2031_v2  ;;  %v2023_v62 = vadd.f32 %v2022_v18, %v2021_v8  ;;  %v4940_v10 = vld [vmem:[#allocation27_spill] sm:$0xff] }
 0x8b2   :  { %v4941_v18 = vld [vmem:[#allocation31_spill] sm:$0xff] }
 0x8b3   :  { %v2029_v3 = vrot.slane %v2028_v44, 1  ;;  %v2034_v13 = vrot.slane %v2033_v63, 2  ;;  %v2059_v31 = vsel %vm571_vm7, %v2023_v62, %v2058_v59  ;;  %v4945_v62 = vld [vmem:[#allocation37_spill] sm:$0xff] }
 0x8b5   :  { %v2035_v58 = vadd.f32 %v2034_v13, %v2033_v63  ;;  %v2030_v11 = vadd.f32 %v2029_v3, %v2028_v44  ;;  %v4942_v63 = vld [vmem:[#allocation30_spill] sm:$0xff]  ;;  %v4944_v3 = vld [vmem:[#allocation32_spill] sm:$0xff] }
 0x8b7   :  { %v2036_v27 = vrot.slane %v2035_v58, 1  ;;  %v2060_v21 = vsel %vm573_vm8, %v2030_v11, %v2059_v31 }
 0x8b9   :  { %v2037_v48 = vadd.f32 %v2036_v27, %v2035_v58 }
 0x8bb   :  { %v2061_v12 = vsel %vm575_vm9, %v2037_v48, %v2060_v21  ;;  %v4947_v48 = vld [vmem:[#allocation35_spill] sm:$0xff] }
 0x8bc   :  { %3167 = vmatmul.mubr.msk.f32.vlgmr.msra.gmra.mrb[12].mxu1 %vm174_vm0, %v2061_v12  ;;  %3012 = vst.msk [vmem:[#allocation17] sm:$0xff] %vm174_vm0, %v2061_v12  ;;  %v4948_v12 = vld [vmem:[#allocation34_spill] sm:$0xff] }
 0x98f   :  { %v2130_v60 = vpop.f32.mrb[12].mxu1 }
 0x990   :  { %v2131_v43 = vadd.f32 %v3074_v1, %v2130_v60  ;;  %v3168_v26 = vpop.f32.mrb[13].mxu1 }
 0x992   :  { %v2135_v23 = vcombine.high %v2131_v43, %v2131_v43  ;;  %v2142_v49 = vrot.slane %v2131_v43, %v4423_v15 }
 0x994   :  { %v2149_v16 = vrot.slane %v2135_v23, %v4423_v15  ;;  %v2150_v6 = vcombine.high %v2142_v49, %v2142_v49  ;;  %v2158_v55 = vrot.slane %v2142_v49, %v4423_v15 }
 0x996   :  { %v2165_v53 = vrot.slane %v2149_v16, %v4423_v15  ;;  %v2172_v14 = vrot.slane %v2150_v6, %v4423_v15  ;;  %v2180_v46 = vcombine.high %v2158_v55, %v2158_v55  ;;  %v2187_v57 = vrot.slane %v2158_v55, %v3958_v32  ;;  %v4950_v55 = vld [vmem:[#allocation38_spill] sm:$0xff] }
 0x997   :  { %v2151_v7 = vcombine.high %v2149_v16, %v2149_v16  ;;  %v4949_v16 = vld [vmem:[#allocation39_spill] sm:$0xff] }
 0x998   :  { %v2181_v42 = vcombine.high %v2165_v53, %v2165_v53  ;;  %v2191_v61 = vrot.slane %v2172_v14, %v3958_v32  ;;  %2216 = vrot.lane.b32.xlu0 %v2187_v57, %s3668_s11  ;;  %v2195_v33 = vrot.slane %v2180_v46, %v3958_v32  ;;  %v2182_v36 = vcombine.high %v2172_v14, %v2172_v14 }
 0x999   :  { %v2203_v25 = vrot.slane %v2165_v53, %v3958_v32  ;;  %v2179_v8 = vrot.slane %v2151_v7, %v4423_v15 }
 0x99a   :  { %2218 = vrot.lane.b32.xlu1 %v2191_v61, %s3668_s11  ;;  %v2211_v39 = vrot.slane %v2181_v42, %v3958_v32  ;;  %v2199_v28 = vrot.slane %v2182_v36, %v3958_v32  ;;  %v4951_v61 = vld [vmem:[#allocation43_spill] sm:$0xff] }
 0x99b   :  { %v2207_v37 = vrot.slane %v2179_v8, %v3958_v32  ;;  %v2183_v2 = vcombine.high %v2179_v8, %v2179_v8 }
 0x99c   :  { %2220 = vrot.lane.b32.xlu0 %v2195_v33, %s3668_s11 }
 0x99d   :  { %v2215_v0 = vrot.slane %v2183_v2, %v3958_v32 }
 0x99e   :  { %2228 = vrot.lane.b32.xlu1 %v2211_v39, %s3668_s11  ;;  %v4952_v39 = vld [vmem:[#allocation41_spill] sm:$0xff] }
 0x9a0   :  { %2224 = vrot.lane.b32.xlu0 %v2203_v25, %s3668_s11 }
 0x9a2   :  { %2277 = vrot.lane.b32.xlu1 %v2275_v29, %s3668_s11 }
 0x9a4   :  { %2222 = vrot.lane.b32.xlu0 %v2199_v28, %s3668_s11 }
 0x9a8   :  { %2226 = vrot.lane.b32.xlu0 %v2207_v37, %s3668_s11  ;;  %v4953_v37 = vld [vmem:[#allocation40_spill] sm:$0xff] }
 0x9ac   :  { %2230 = vrot.lane.b32.xlu0 %v2215_v0, %s3668_s11  ;;  %v4954_v0 = vld [vmem:[#allocation42_spill] sm:$0xff] }
 0xa0a   :  { %v2217_v17 = vpop.permute.xlu0 %2216 }
 0xa0b   :  { %v2240_v34 = vadd.f32 %v2217_v17, %v4939_v5  ;;  %v2241_v35 = vadd.f32 %v2217_v17, %v4940_v10 }
 0xa0c   :  { %v2219_v24 = vpop.permute.xlu1 %2218 }
 0xa0d   :  { %v2242_v44 = vadd.f32 %v2219_v24, %v4941_v18  ;;  %v2243_v15 = vadd.f32 %v2219_v24, %v4942_v63  ;;  %3334 = vtanh.f32 %v2240_v34 }
 0xa0e   :  { %3336 = vtanh.f32 %v2241_v35  ;;  %v2221_v40 = vpop.permute.xlu0 %2220 }
 0xa0f   :  { %3338 = vtanh.f32 %v2242_v44  ;;  %v2244_v52 = vadd.f32 %v2221_v40, %v4943_v41  ;;  %v2245_v13 = vadd.f32 %v2221_v40, %v4944_v3 }
 0xa10   :  { %3340 = vtanh.f32 %v2243_v15  ;;  %v2229_v50 = vpop.permute.xlu1 %2228 }
 0xa11   :  { %3342 = vtanh.f32 %v2244_v52  ;;  %v2252_v33 = vadd.f32 %v2229_v50, %v4951_v61  ;;  %v2253_v29 = vadd.f32 %v2229_v50, %v4952_v39 }
 0xa12   :  { %v2225_v9 = vpop.permute.xlu0 %2224  ;;  %3344 = vtanh.f32 %v2245_v13 }
 0xa13   :  { %v2248_v58 = vadd.f32 %v2225_v9, %v4945_v62  ;;  %v2249_v11 = vadd.f32 %v2225_v9, %v4946_v20 }
 0xa14   :  { %v4576_v4 = vpop.permute.xlu1 %2277 }
 0xa15   :  { %3346 = vtanh.f32 %v2248_v58 }
 0xa16   :  { %v2223_v27 = vpop.permute.xlu0 %2222  ;;  %3348 = vtanh.f32 %v2249_v11 }
 0xa17   :  { %v3335_v59 = vpop.eup %3334  ;;  %v2246_v31 = vadd.f32 %v2223_v27, %v4947_v48  ;;  %v2247_v1 = vadd.f32 %v2223_v27, %v4948_v12 }
 0xa18   :  { %v3337_v21 = vpop.eup %3336  ;;  %v2280_v60 = vmul.f32 %v3335_v59, %v4576_v4 }
 0xa19   :  { %v3339_v43 = vpop.eup %3338  ;;  %v2281_v26 = vmul.f32 %v3337_v21, %v4576_v4  ;;  %3350 = vtanh.f32 %v2246_v31 }
 0xa1a   :  { %v3341_v23 = vpop.eup %3340  ;;  %v2227_v49 = vpop.permute.xlu0 %2226  ;;  %2312 = vrot.lane.b32.xlu0 %v2280_v60, %s3669_s30  ;;  %3352 = vtanh.f32 %v2247_v1  ;;  %v2282_v14 = vmul.f32 %v3339_v43, %v4576_v4 }
 0xa1b   :  { %2314 = vrot.lane.b32.xlu1 %v2281_v26, %s3669_s30  ;;  %v2250_v6 = vadd.f32 %v2227_v49, %v4949_v16  ;;  %v2251_v53 = vadd.f32 %v2227_v49, %v4950_v55  ;;  %v3343_v46 = vpop.eup %3342  ;;  %v2283_v57 = vmul.f32 %v3341_v23, %v4576_v4 }
 0xa1c   :  { %v3345_v42 = vpop.eup %3344  ;;  %v2284_v36 = vmul.f32 %v3343_v46, %v4576_v4 }
 0xa1d   :  { %3354 = vtanh.f32 %v2250_v6  ;;  %v2285_v8 = vmul.f32 %v3345_v42, %v4576_v4 }
 0xa1e   :  { %2316 = vrot.lane.b32.xlu0 %v2282_v14, %s3669_s30  ;;  %3356 = vtanh.f32 %v2251_v53  ;;  %v2231_v7 = vpop.permute.xlu0 %2230 }
 0xa1f   :  { %2318 = vrot.lane.b32.xlu1 %v2283_v57, %s3669_s30  ;;  %v3347_v25 = vpop.eup %3346  ;;  %3358 = vtanh.f32 %v2252_v33  ;;  %v2254_v2 = vadd.f32 %v2231_v7, %v4953_v37  ;;  %v2255_v17 = vadd.f32 %v2231_v7, %v4954_v0 }
 0xa20   :  { %v3349_v28 = vpop.eup %3348  ;;  %3360 = vtanh.f32 %v2253_v29  ;;  %v2288_v5 = vmul.f32 %v3347_v25, %v4576_v4 }
 0xa21   :  { %v2289_v10 = vmul.f32 %v3349_v28, %v4576_v4  ;;  %3362 = vtanh.f32 %v2254_v2 }
 0xa22   :  { %2320 = vrot.lane.b32.xlu0 %v2284_v36, %s3669_s30  ;;  %3364 = vtanh.f32 %v2255_v17 }
 0xa23   :  { %2322 = vrot.lane.b32.xlu1 %v2285_v8, %s3669_s30  ;;  %v3351_v34 = vpop.eup %3350 }
 0xa24   :  { %v3353_v35 = vpop.eup %3352  ;;  %v2286_v24 = vmul.f32 %v3351_v34, %v4576_v4 }
 0xa25   :  { %v2287_v44 = vmul.f32 %v3353_v35, %v4576_v4 }
 0xa26   :  { %2328 = vrot.lane.b32.xlu0 %v2288_v5, %s3669_s30 }
 0xa27   :  { %2330 = vrot.lane.b32.xlu1 %v2289_v10, %s3669_s30  ;;  %v3355_v18 = vpop.eup %3354 }
 0xa28   :  { %v3357_v63 = vpop.eup %3356  ;;  %v2290_v15 = vmul.f32 %v3355_v18, %v4576_v4 }
 0xa29   :  { %v3359_v40 = vpop.eup %3358  ;;  %v2291_v41 = vmul.f32 %v3357_v63, %v4576_v4 }
 0xa2a   :  { %2324 = vrot.lane.b32.xlu0 %v2286_v24, %s3669_s30  ;;  %v3361_v52 = vpop.eup %3360  ;;  %v2292_v3 = vmul.f32 %v3359_v40, %v4576_v4  ;;  %v2409_v24 = vstv %s3076_s2 }
 0xa2b   :  { %2326 = vrot.lane.b32.xlu1 %v2287_v44, %s3669_s30  ;;  %v3363_v13 = vpop.eup %3362  ;;  %v2293_v50 = vmul.f32 %v3361_v52, %v4576_v4 }
 0xa2c   :  { %v3365_v9 = vpop.eup %3364  ;;  %v2294_v62 = vmul.f32 %v3363_v13, %v4576_v4 }
 0xa2d   :  { %v2295_v58 = vmul.f32 %v3365_v9, %v4576_v4 }
 0xa2e   :  { %2332 = vrot.lane.b32.xlu0 %v2290_v15, %s3669_s30 }
 0xa2f   :  { %2334 = vrot.lane.b32.xlu1 %v2291_v41, %s3669_s30 }
 0xa32   :  { %2336 = vrot.lane.b32.xlu0 %v2292_v3, %s3669_s30 }
 0xa33   :  { %2338 = vrot.lane.b32.xlu1 %v2293_v50, %s3669_s30 }
 0xa36   :  { %2340 = vrot.lane.b32.xlu0 %v2294_v62, %s3669_s30 }
 0xa37   :  { %2342 = vrot.lane.b32.xlu1 %v2295_v58, %s3669_s30 }
 0xa8c   :  { %v2313_v20 = vpop.permute.xlu0 %2312 }
 0xa8d   :  { %v2315_v11 = vpop.permute.xlu1 %2314  ;;  %v2360_v27 = vsel %vm404_vm1, %v2313_v20, 0.0 }
 0xa8e   :  { %v2363_v59 = vsel %vm404_vm1, %v2315_v11, 0.0  ;;  %2361 = vadd.xlane.f32.xlu0 %v2360_v27 }
 0xa8f   :  { %2364 = vadd.xlane.f32.xlu1 %v2363_v59 }
 0xa90   :  { %v2317_v48 = vpop.permute.xlu0 %2316 }
 0xa91   :  { %v2319_v31 = vpop.permute.xlu1 %2318  ;;  %v2366_v21 = vsel %vm404_vm1, %v2317_v48, 0.0 }
 0xa92   :  { %2367 = vadd.xlane.f32.xlu0 %v2366_v21  ;;  %v2369_v4 = vsel %vm404_vm1, %v2319_v31, 0.0 }
 0xa94   :  { %v2321_v12 = vpop.permute.xlu0 %2320 }
 0xa95   :  { %v2323_v1 = vpop.permute.xlu1 %2322  ;;  %v2372_v26 = vsel %vm404_vm1, %v2321_v12, 0.0 }
 0xa96   :  { %v2375_v60 = vsel %vm404_vm1, %v2323_v1, 0.0  ;;  %2370 = vadd.xlane.f32.xlu0 %v2369_v4 }
 0xa97   :  { %2376 = vadd.xlane.f32.xlu1 %v2375_v60 }
 0xa98   :  { %v2329_v43 = vpop.permute.xlu0 %2328 }
 0xa99   :  { %v2331_v23 = vpop.permute.xlu1 %2330  ;;  %v2384_v6 = vsel %vm404_vm1, %v2329_v43, 0.0 }
 0xa9a   :  { %v2387_v49 = vsel %vm404_vm1, %v2331_v23, 0.0  ;;  %2373 = vadd.xlane.f32.xlu0 %v2372_v26 }
 0xa9b   :  { %2388 = vadd.xlane.f32.xlu1 %v2387_v49 }
 0xa9c   :  { %v2325_v16 = vpop.permute.xlu0 %2324 }
 0xa9d   :  { %v2327_v55 = vpop.permute.xlu1 %2326  ;;  %v2378_v46 = vsel %vm404_vm1, %v2325_v16, 0.0 }
 0xa9e   :  { %v2381_v53 = vsel %vm404_vm1, %v2327_v55, 0.0  ;;  %2385 = vadd.xlane.f32.xlu0 %v2384_v6 }
 0xa9f   :  { %2382 = vadd.xlane.f32.xlu1 %v2381_v53 }
 0xaa0   :  { %v2333_v14 = vpop.permute.xlu0 %2332 }
 0xaa1   :  { %v2335_v57 = vpop.permute.xlu1 %2334  ;;  %v2390_v33 = vsel %vm404_vm1, %v2333_v14, 0.0 }
 0xaa2   :  { %v2393_v42 = vsel %vm404_vm1, %v2335_v57, 0.0  ;;  %2379 = vadd.xlane.f32.xlu0 %v2378_v46 }
 0xaa3   :  { %2394 = vadd.xlane.f32.xlu1 %v2393_v42 }
 0xaa4   :  { %v2337_v61 = vpop.permute.xlu0 %2336 }
 0xaa5   :  { %v2339_v39 = vpop.permute.xlu1 %2338  ;;  %v2396_v7 = vsel %vm404_vm1, %v2337_v61, 0.0 }
 0xaa6   :  { %v2399_v29 = vsel %vm404_vm1, %v2339_v39, 0.0  ;;  %2391 = vadd.xlane.f32.xlu0 %v2390_v33 }
 0xaa7   :  { %2400 = vadd.xlane.f32.xlu1 %v2399_v29 }
 0xaa8   :  { %v2341_v8 = vpop.permute.xlu0 %2340 }
 0xaa9   :  { %v2343_v36 = vpop.permute.xlu1 %2342  ;;  %v2402_v28 = vsel %vm404_vm1, %v2341_v8, 0.0 }
 0xaaa   :  { %v2405_v25 = vsel %vm404_vm1, %v2343_v36, 0.0  ;;  %2397 = vadd.xlane.f32.xlu0 %v2396_v7 }
 0xaab   :  { %2406 = vadd.xlane.f32.xlu1 %v2405_v25 }
 0xaae   :  { %2403 = vadd.xlane.f32.xlu0 %v2402_v28 }
 0xb1b   :  { %v2362_v37 = vpop.xlane.xlu0 %2361 }
 0xb1c   :  { %v2365_v0 = vpop.xlane.xlu1 %2364  ;;  %v4636_v63 = vadd.f32 %v2409_v24, %v2362_v37 }
 0xb1d   :  { %v2411_v41 = vadd.f32 %v2409_v24, %v2365_v0 }
 0xb1e   :  { %v2445_v58 = vrot.slane %v4636_v63, %v4091_v19 }
 0xb1f   :  { %v2368_v2 = vpop.xlane.xlu0 %2367  ;;  %v2449_v27 = vrot.slane %v2411_v41, %v4106_v30 }
 0xb20   :  { %v4640_v52 = vadd.f32 %v2409_v24, %v2368_v2 }
 0xb21   :  { %v2450_v6 = vsel %vm498_vm2, %v2449_v27, %v2445_v58 }
 0xb22   :  { %v2454_v59 = vrot.slane %v4640_v52, %v4091_v19 }
 0xb23   :  { %v2371_v17 = vpop.xlane.xlu0 %2370 }
 0xb24   :  { %v2377_v5 = vpop.xlane.xlu1 %2376  ;;  %v4634_v44 = vadd.f32 %v2409_v24, %v2371_v17 }
 0xb25   :  { %v4644_v50 = vadd.f32 %v2409_v24, %v2377_v5 }
 0xb26   :  { %v2458_v9 = vrot.slane %v4634_v44, %v4106_v30 }
 0xb27   :  { %v2374_v34 = vpop.xlane.xlu0 %2373  ;;  %v2467_v12 = vrot.slane %v4644_v50, %v4106_v30 }
 0xb28   :  { %v2389_v10 = vpop.xlane.xlu1 %2388  ;;  %v4638_v15 = vadd.f32 %v2409_v24, %v2374_v34  ;;  %v2459_v1 = vsel %vm498_vm2, %v2458_v9, %v2454_v59 }
 0xb29   :  { %v4670_v26 = vadd.f32 %v2409_v24, %v2389_v10  ;;  %v2514_v57 = vsel %vm563_vm3, %v2459_v1, %v2450_v6 }
 0xb2a   :  { %v2463_v20 = vrot.slane %v4638_v15, %v4091_v19 }
 0xb2b   :  { %v2386_v35 = vpop.xlane.xlu0 %2385  ;;  %v2485_v7 = vrot.slane %v4670_v26, %v4106_v30 }
 0xb2c   :  { %v2383_v18 = vpop.xlane.xlu1 %2382  ;;  %v4663_v4 = vadd.f32 %v2409_v24, %v2386_v35  ;;  %v2468_v23 = vsel %vm498_vm2, %v2467_v12, %v2463_v20 }
 0xb2d   :  { %v4648_v62 = vadd.f32 %v2409_v24, %v2383_v18  ;;  %v2515_v61 = vsel %vm565_vm4, %v2468_v23, %v2514_v57 }
 0xb2e   :  { %v2481_v42 = vrot.slane %v4663_v4, %v4091_v19 }
 0xb2f   :  { %v2380_v40 = vpop.xlane.xlu0 %2379  ;;  %v2476_v60 = vrot.slane %v4648_v62, %v4106_v30 }
 0xb30   :  { %v2395_v3 = vpop.xlane.xlu1 %2394  ;;  %v4642_v13 = vadd.f32 %v2409_v24, %v2380_v40  ;;  %v2486_v2 = vsel %vm498_vm2, %v2485_v7, %v2481_v42 }
 0xb31   :  { %v4668_v43 = vadd.f32 %v2409_v24, %v2395_v3 }
 0xb32   :  { %v2472_v48 = vrot.slane %v4642_v13, %v4091_v19 }
 0xb33   :  { %v2392_v11 = vpop.xlane.xlu0 %2391  ;;  %v2494_v33 = vrot.slane %v4668_v43, %v4106_v30 }
 0xb34   :  { %v2401_v31 = vpop.xlane.xlu1 %2400  ;;  %v4659_v21 = vadd.f32 %v2409_v24, %v2392_v11  ;;  %v2477_v55 = vsel %vm498_vm2, %v2476_v60, %v2472_v48 }
 0xb35   :  { %v4673_v49 = vadd.f32 %v2409_v24, %v2401_v31  ;;  %v2516_v36 = vsel %vm567_vm5, %v2477_v55, %v2515_v61 }
 0xb36   :  { %v2490_v53 = vrot.slane %v4659_v21, %v4091_v19  ;;  %v2517_v34 = vsel %vm569_vm6, %v2486_v2, %v2516_v36 }
 0xb37   :  { %v2398_v16 = vpop.xlane.xlu0 %2397  ;;  %v2503_v25 = vrot.slane %v4673_v49, %v4106_v30 }
 0xb38   :  { %v2407_v14 = vpop.xlane.xlu1 %2406  ;;  %v4679_v46 = vadd.f32 %v2409_v24, %v2398_v16  ;;  %v2495_v28 = vsel %vm498_vm2, %v2494_v33, %v2490_v53 }
 0xb39   :  { %v4687_v39 = vadd.f32 %v2409_v24, %v2407_v14  ;;  %v2518_v10 = vsel %vm571_vm7, %v2495_v28, %v2517_v34 }
 0xb3a   :  { %v2499_v29 = vrot.slane %v4679_v46, %v4091_v19 }
 0xb3b   :  { %v2404_v8 = vpop.xlane.xlu0 %2403  ;;  %v2512_v17 = vrot.slane %v4687_v39, %v4106_v30 }
 0xb3c   :  { %v4697_v37 = vadd.f32 %v2409_v24, %v2404_v8  ;;  %v2504_v0 = vsel %vm498_vm2, %v2503_v25, %v2499_v29 }
 0xb3d   :  { %v2519_v18 = vsel %vm573_vm8, %v2504_v0, %v2518_v10 }
 0xb3e   :  { %v2508_v5 = vrot.slane %v4697_v37, %v4091_v19 }
 0xb40   :  { %v2513_v35 = vsel %vm498_vm2, %v2512_v17, %v2508_v5 }
 0xb41   :  { %v2520_v24 = vsel %vm575_vm9, %v2513_v35, %v2519_v18 }
 0xb42   :  { %v2522_v40 = vsel %vm174_vm0, %v2520_v24, -inf }
 0xb43   :  { %2523 = vmax.xlane.f32.xlu0 %v2522_v40 }
 0xbd0   :  { %v2524_v3 = vpop.xlane.xlu0 %2523 }
 0xbd1   :  { %v2529_v9 = vrot.slane %v2524_v3, %v3958_v32  ;;  %v2533_v58 = vrot.slane %v2524_v3, %v4058_v38  ;;  %v2537_v20 = vrot.slane %v2524_v3, %v4051_v45  ;;  %v2541_v48 = vrot.slane %v2524_v3, %v4055_v22 }
 0xbd2   :  { %v2545_v16 = vrot.slane %v2524_v3, %v4062_v47  ;;  %v2553_v57 = vrot.slane %v2524_v3, %v4073_v54 }
 0xbd3   :  { %v2566_v11 = vsub.f32 %v4636_v63, %v2529_v9  ;;  %v2567_v27 = vsub.f32 %v2411_v41, %v2529_v9  ;;  %v2568_v59 = vsub.f32 %v4640_v52, %v2533_v58  ;;  %v2571_v31 = vsub.f32 %v4644_v50, %v2537_v20 }
 0xbd4   :  { %v2569_v60 = vsub.f32 %v4634_v44, %v2533_v58  ;;  %v2573_v6 = vsub.f32 %v4648_v62, %v2541_v48  ;;  %v2570_v63 = vsub.f32 %v4638_v15, %v2537_v20  ;;  %v2549_v52 = vrot.slane %v2524_v3, %v4067_v51 }
 0xbd5   :  { %v2582_v12 = vmul.f32 1.442695, %v2566_v11  ;;  %v2584_v1 = vmul.f32 1.442695, %v2567_v27  ;;  %v2586_v23 = vmul.f32 1.442695, %v2568_v59  ;;  %v2575_v50 = vsub.f32 %v4670_v26, %v2545_v16 }
 0xbd6   :  { %v2592_v55 = vmul.f32 1.442695, %v2571_v31  ;;  %v2588_v41 = vmul.f32 1.442695, %v2569_v60  ;;  %v2596_v53 = vmul.f32 1.442695, %v2573_v6  ;;  %v2572_v44 = vsub.f32 %v4642_v13, %v2541_v48 }
 0xbd7   :  { %3366 = vpow2.f32 %v2582_v12  ;;  %v2590_v14 = vmul.f32 1.442695, %v2570_v63  ;;  %v2577_v62 = vsub.f32 %v4668_v43, %v2549_v52  ;;  %v2600_v42 = vmul.f32 1.442695, %v2575_v50 }
 0xbd8   :  { %3368 = vpow2.f32 %v2584_v1  ;;  %v2574_v26 = vsub.f32 %v4663_v4, %v2545_v16  ;;  %v2594_v33 = vmul.f32 1.442695, %v2572_v44  ;;  %v2557_v13 = vrot.slane %v2524_v3, %v4080_v56 }
 0xbd9   :  { %3370 = vpow2.f32 %v2586_v23  ;;  %v2579_v29 = vsub.f32 %v4673_v49, %v2553_v57  ;;  %v2604_v43 = vmul.f32 1.442695, %v2577_v62  ;;  %v2576_v25 = vsub.f32 %v4659_v21, %v2549_v52 }
 0xbda   :  { %3372 = vpow2.f32 %v2592_v55  ;;  %v2598_v4 = vmul.f32 1.442695, %v2574_v26  ;;  %v2581_v8 = vsub.f32 %v4687_v39, %v2557_v13  ;;  %v2578_v0 = vsub.f32 %v4679_v46, %v2553_v57 }
 0xbdb   :  { %3374 = vpow2.f32 %v2588_v41  ;;  %v2608_v28 = vmul.f32 1.442695, %v2579_v29  ;;  %v2602_v17 = vmul.f32 1.442695, %v2576_v25  ;;  %v2580_v39 = vsub.f32 %v4697_v37, %v2557_v13 }
 0xbdc   :  { %3376 = vpow2.f32 %v2596_v53  ;;  %v2612_v21 = vmul.f32 1.442695, %v2581_v8  ;;  %v2606_v10 = vmul.f32 1.442695, %v2578_v0 }
 0xbdd   :  { %3378 = vpow2.f32 %v2590_v14  ;;  %v2610_v18 = vmul.f32 1.442695, %v2580_v39 }
 0xbde   :  { %3380 = vpow2.f32 %v2600_v42 }
 0xbdf   :  { %3382 = vpow2.f32 %v2594_v33 }
 0xbe0   :  { %3384 = vpow2.f32 %v2604_v43 }
 0xbe1   :  { %v4727_v61 = vpop.eup %3366  ;;  %3386 = vpow2.f32 %v2598_v4 }
 0xbe2   :  { %v4729_v15 = vpop.eup %3368  ;;  %2631 = vperm.xlu1 %3204, %v4727_v61   ;;  %3388 = vpow2.f32 %v2608_v28 }
 0xbe3   :  { %2634 = vperm.xlu0 %3205, %v4729_v15   ;;  %v4736_v7 = vpop.eup %3370  ;;  %3390 = vpow2.f32 %v2602_v17 }
 0xbe4   :  { %v4738_v36 = vpop.eup %3372  ;;  %3392 = vpow2.f32 %v2612_v21 }
 0xbe5   :  { %v4744_v2 = vpop.eup %3374  ;;  %3394 = vpow2.f32 %v2606_v10 }
 0xbe6   :  { %2637 = vperm.xlu1 %3204, %v4736_v7   ;;  %v4746_v49 = vpop.eup %3376  ;;  %3396 = vpow2.f32 %v2610_v18 }
 0xbe7   :  { %2646 = vperm.xlu0 %3205, %v4738_v36   ;;  %v4751_v5 = vpop.eup %3378 }
 0xbe8   :  { %v4753_v34 = vpop.eup %3380 }
 0xbe9   :  { %v4758_v46 = vpop.eup %3382 }
 0xbea   :  { %2640 = vperm.xlu1 %3204, %v4744_v2   ;;  %v4760_v35 = vpop.eup %3384 }
 0xbeb   :  { %2652 = vperm.xlu0 %3205, %v4746_v49   ;;  %v4764_v24 = vpop.eup %3386 }
 0xbec   :  { %v4766_v40 = vpop.eup %3388 }
 0xbed   :  { %v4770_v37 = vpop.eup %3390 }
 0xbee   :  { %2643 = vperm.xlu1 %3204, %v4751_v5   ;;  %v4772_v3 = vpop.eup %3392 }
 0xbef   :  { %2658 = vperm.xlu0 %3205, %v4753_v34   ;;  %v4776_v9 = vpop.eup %3394 }
 0xbf0   :  { %v4779_v58 = vpop.eup %3396 }
 0xbf2   :  { %2649 = vperm.xlu1 %3204, %v4758_v46  }
 0xbf3   :  { %2664 = vperm.xlu0 %3205, %v4760_v35  }
 0xbf6   :  { %2655 = vperm.xlu1 %3204, %v4764_v24  }
 0xbf7   :  { %2670 = vperm.xlu0 %3205, %v4766_v40  }
 0xbfa   :  { %2661 = vperm.xlu1 %3204, %v4770_v37  }
 0xbfb   :  { %2676 = vperm.xlu0 %3205, %v4772_v3  }
 0xbfe   :  { %2667 = vperm.xlu1 %3204, %v4776_v9  }
 0xc02   :  { %2673 = vperm.xlu1 %3204, %v4779_v58  }
 0xc61   :  { %v2632_v20 = vpop.permute.xlu1 %2631 }
 0xc62   :  { %v2635_v11 = vpop.permute.xlu0 %2634  ;;  %v2681_v50 = vrot.slane %v2632_v20, %v4091_v19 }
 0xc63   :  { %v2685_v52 = vrot.slane %v2635_v11, %v4106_v30 }
 0xc65   :  { %v2638_v27 = vpop.permute.xlu1 %2637  ;;  %v2686_v43 = vsel %vm498_vm2, %v2685_v52, %v2681_v50 }
 0xc66   :  { %v2647_v59 = vpop.permute.xlu0 %2646  ;;  %v2690_v53 = vrot.slane %v2638_v27, %v4091_v19 }
 0xc67   :  { %v2703_v14 = vrot.slane %v2647_v59, %v4106_v30 }
 0xc69   :  { %v2641_v48 = vpop.permute.xlu1 %2640 }
 0xc6a   :  { %v2653_v31 = vpop.permute.xlu0 %2652  ;;  %v2694_v6 = vrot.slane %v2641_v48, %v4106_v30 }
 0xc6b   :  { %v2712_v62 = vrot.slane %v2653_v31, %v4106_v30 }
 0xc6c   :  { %v2695_v42 = vsel %vm498_vm2, %v2694_v6, %v2690_v53 }
 0xc6d   :  { %v2644_v12 = vpop.permute.xlu1 %2643  ;;  %v2750_v28 = vsel %vm563_vm3, %v2695_v42, %v2686_v43 }
 0xc6e   :  { %v2659_v1 = vpop.permute.xlu0 %2658  ;;  %v2699_v55 = vrot.slane %v2644_v12, %v4091_v19 }
 0xc6f   :  { %v2721_v33 = vrot.slane %v2659_v1, %v4106_v30 }
 0xc70   :  { %v2704_v13 = vsel %vm498_vm2, %v2703_v14, %v2699_v55 }
 0xc71   :  { %v2650_v60 = vpop.permute.xlu1 %2649  ;;  %v2751_v39 = vsel %vm565_vm4, %v2704_v13, %v2750_v28 }
 0xc72   :  { %v2665_v23 = vpop.permute.xlu0 %2664  ;;  %v2708_v44 = vrot.slane %v2650_v60, %v4091_v19 }
 0xc73   :  { %v2730_v25 = vrot.slane %v2665_v23, %v4106_v30 }
 0xc74   :  { %v2713_v4 = vsel %vm498_vm2, %v2712_v62, %v2708_v44 }
 0xc75   :  { %v2656_v16 = vpop.permute.xlu1 %2655  ;;  %v2752_v18 = vsel %vm567_vm5, %v2713_v4, %v2751_v39 }
 0xc76   :  { %v2671_v63 = vpop.permute.xlu0 %2670  ;;  %v2717_v57 = vrot.slane %v2656_v16, %v4091_v19 }
 0xc77   :  { %v2739_v0 = vrot.slane %v2671_v63, %v4106_v30 }
 0xc78   :  { %v2722_v17 = vsel %vm498_vm2, %v2721_v33, %v2717_v57 }
 0xc79   :  { %v2662_v41 = vpop.permute.xlu1 %2661  ;;  %v2753_v27 = vsel %vm569_vm6, %v2722_v17, %v2752_v18 }
 0xc7a   :  { %v2726_v26 = vrot.slane %v2662_v41, %v4091_v19  ;;  %v2677_v21 = vpop.permute.xlu0 %2676 }
 0xc7b   :  { %v2748_v59 = vrot.slane %v2677_v21, %v4106_v30 }
 0xc7c   :  { %v2731_v10 = vsel %vm498_vm2, %v2730_v25, %v2726_v26 }
 0xc7d   :  { %v2668_v29 = vpop.permute.xlu1 %2667  ;;  %v2754_v31 = vsel %vm571_vm7, %v2731_v10, %v2753_v27 }
 0xc7e   :  { %v2735_v8 = vrot.slane %v2668_v29, %v4091_v19 }
 0xc80   :  { %v2740_v20 = vsel %vm498_vm2, %v2739_v0, %v2735_v8 }
 0xc81   :  { %v2674_v11 = vpop.permute.xlu1 %2673  ;;  %v2755_v1 = vsel %vm573_vm8, %v2740_v20, %v2754_v31 }
 0xc82   :  { %v2744_v48 = vrot.slane %v2674_v11, %v4091_v19 }
 0xc84   :  { %v2749_v12 = vsel %vm498_vm2, %v2748_v59, %v2744_v48 }
 0xc85   :  { %v2756_v60 = vsel %vm575_vm9, %v2749_v12, %v2755_v1 }
 0xc86   :  { %v2758_v23 = vsel %vm174_vm0, %v2756_v60, 0.0 }
 0xc87   :  { %2759 = vadd.xlane.f32.xlu1 %v2758_v23 }
 0xd14   :  { %v2760_v16 = vpop.xlane.xlu1 %2759 }
 0xd15   :  { %v2781_v6 = vrot.slane %v2760_v16, %v4062_v47  ;;  %v2765_v55 = vrot.slane %v2760_v16, %v3958_v32  ;;  %v2793_v30 = vrot.slane %v2760_v16, %v4080_v56  ;;  %v2769_v19 = vrot.slane %v2760_v16, %v4058_v38 }
 0xd16   :  { %v2773_v50 = vrot.slane %v2760_v16, %v4051_v45  ;;  %v2777_v38 = vrot.slane %v2760_v16, %v4055_v22 }
 0xd17   :  { %3398 = vrcp.f32 %v2781_v6 }
 0xd18   :  { %3400 = vrcp.f32 %v2765_v55 }
 0xd19   :  { %3402 = vrcp.f32 %v2793_v30 }
 0xd1a   :  { %3404 = vrcp.f32 %v2769_v19 }
 0xd1b   :  { %3406 = vrcp.f32 %v2773_v50 }
 0xd1c   :  { %3408 = vrcp.f32 %v2777_v38 }
 0xd21   :  { %v3399_v63 = vpop.eup %3398 }
 0xd22   :  { %v3401_v41 = vpop.eup %3400  ;;  %v2816_v52 = vmul.f32 %v3399_v63, %v4753_v34 }
 0xd23   :  { %v3403_v53 = vpop.eup %3402  ;;  %v2803_v44 = vmul.f32 %v3401_v41, %v4727_v61  ;;  %v2804_v47 = vmul.f32 %v3401_v41, %v4729_v15 }
 0xd24   :  { %2873 = vperm.xlu1 %3204, %v2816_v52   ;;  %v2825_v32 = vmul.f32 %v3403_v53, %v4772_v3  ;;  %v3405_v56 = vpop.eup %3404  ;;  %v2785_v3 = vrot.slane %v2760_v16, %v4067_v51 }
 0xd25   :  { %2828 = vperm.xlu0 %3205, %v2803_v44   ;;  %v2806_v14 = vmul.f32 %v3405_v56, %v4736_v7  ;;  %v2807_v45 = vmul.f32 %v3405_v56, %v4744_v2  ;;  %v3407_v34 = vpop.eup %3406  ;;  %v2789_v7 = vrot.slane %v2760_v16, %v4073_v54  ;;  %v2815_v2 = vmul.f32 %v3399_v63, %v4764_v24 }
 0xd26   :  { %v2809_v61 = vmul.f32 %v3407_v34, %v4751_v5  ;;  %v2810_v15 = vmul.f32 %v3407_v34, %v4738_v36  ;;  %v3409_v57 = vpop.eup %3408  ;;  %3410 = vrcp.f32 %v2785_v3 }
 0xd27   :  { %v2812_v22 = vmul.f32 %v3409_v57, %v4758_v46  ;;  %v2813_v62 = vmul.f32 %v3409_v57, %v4746_v49  ;;  %3412 = vrcp.f32 %v2789_v7  ;;  %v2824_v49 = vmul.f32 %v3403_v53, %v4779_v58 }
 0xd28   :  { %2903 = vperm.xlu1 %3204, %v2825_v32  }
 0xd29   :  { %2833 = vperm.xlu0 %3205, %v2804_v47  }
 0xd2d   :  { %2838 = vperm.xlu0 %3205, %v2806_v14  }
 0xd30   :  { %v3411_v5 = vpop.eup %3410 }
 0xd31   :  { %2843 = vperm.xlu0 %3205, %v2807_v45   ;;  %v2818_v51 = vmul.f32 %v3411_v5, %v4770_v37  ;;  %v2819_v36 = vmul.f32 %v3411_v5, %v4760_v35  ;;  %v3413_v42 = vpop.eup %3412 }
 0xd32   :  { %v2821_v46 = vmul.f32 %v3413_v42, %v4776_v9  ;;  %v2822_v54 = vmul.f32 %v3413_v42, %v4766_v40 }
 0xd35   :  { %2848 = vperm.xlu0 %3205, %v2809_v61  }
 0xd39   :  { %2853 = vperm.xlu0 %3205, %v2810_v15  }
 0xd3d   :  { %2858 = vperm.xlu0 %3205, %v2812_v22  }
 0xd41   :  { %2863 = vperm.xlu0 %3205, %v2813_v62  }
 0xd45   :  { %2868 = vperm.xlu0 %3205, %v2815_v2  }
 0xd49   :  { %2878 = vperm.xlu0 %3205, %v2818_v51  }
 0xd4d   :  { %2883 = vperm.xlu0 %3205, %v2819_v36  }
 0xd51   :  { %2888 = vperm.xlu0 %3205, %v2821_v46  }
 0xd55   :  { %2893 = vperm.xlu0 %3205, %v2822_v54  }
 0xd59   :  { %2898 = vperm.xlu0 %3205, %v2824_v49  }
 0xd5a   :  { %3606 = shalt.err (!%p3603_p7)
}
 0xd5b   :  { %s3607_s7 = scalar_lea.hbm %s4900_s14, 128 }
 0xd5c   :  { %p3608_p8 = scmp.ne.s32.totalorder %s4900_s14, %s3607_s7  ;;  %p3611_p9 = scmp.lt.u32.totalorder %s3607_s7, %s4900_s14 }
 0xd5e   :  { %p3613_p10 = pnand %p3611_p9, %p3608_p8 }
 0xd60   :  { %3616 = shalt.err (!%p3613_p10)
}
 0xd61   :  { %3032 = dma.vmem_to_hbm [thread:$0]  %s3030_s15, 128, %s4900_s14, [#allocation18]   ;;  %v3415_v13 = vld [vmem:[#allocation4 + $0x18] sm:$0xff]  ;;  %v3416_v43 = vld [vmem:[#allocation4 + $0x28] sm:$0xff]  ;;  %v3418_v0 = vld [vmem:[#allocation4 + $0x10] sm:$0xff] }
 0xd62   :  { %v3417_v8 = vld [vmem:[#allocation4 + $0x8] sm:$0xff]  ;;  %v3419_v21 = vld [vmem:[#allocation4 + $0x38] sm:$0xff]  ;;  %v3420_v10 = vld [vmem:[#allocation4 + $0x20] sm:$0xff]  ;;  %s3671_s14 = smov [#allocation16]  }
 0xd63   :  { %v3421_v11 = vld [vmem:[#allocation4] sm:$0xff]  ;;  %v3422_v48 = vld [vmem:[#allocation4 + $0x30] sm:$0xff]  ;;  %v3424_v60 = vld [vmem:[#allocation4 + $0x48] sm:$0xff]  ;;  %s3019_s22 = sshll.u32 %s3671_s14, 4  ;;  %s3020_s22 = int_to_ptr.vmem [resolvable:$true] %s3019_s22 }
 0xd64   :  { %v3423_v12 = vld [vmem:[#allocation4 + $0x40] sm:$0xff]  ;;  %v3425_v14 = vld [vmem:[#allocation4 + $0x50] sm:$0xff]  ;;  %v3426_v15 = vld [vmem:[#allocation4 + $0x58] sm:$0xff]  ;;  %s3617_s23 = scalar_lea.vmem %s3020_s22, 128  ;;  %p3622_p12 = scmp.lt.s32.totalorder %s3020_s22, %s3020_s22 }
 0xd65   :  { %p3618_p11 = scmp.ne.s32.totalorder %s3020_s22, %s3617_s23  ;;  %p3623_p13 = scmp.lt.s32.totalorder %s3617_s23, %s3617_s23 }
 0xd67   :  { %p3624_p0 = por %p3623_p13, %p3622_p12 }
 0xd69   :  { %p3625_p1 = pnand %p3624_p0, %p3618_p11 }
 0xda3   :  { %v2874_v4 = vpop.permute.xlu1 %2873 }
 0xda4   :  { %v2829_v35 = vpop.permute.xlu0 %2828  ;;  %v2915_v23 = vmul.f32 %v3424_v60, %v2874_v4 }
 0xda5   :  { %v2906_v27 = vmul.f32 %v3421_v11, %v2829_v35 }
 0xda6   :  { %v2959_v32 = vsel %vm174_vm0, %v2915_v23, 0.0 }
 0xda7   :  { %v2922_v50 = vsel %vm174_vm0, %v2906_v27, 0.0  ;;  %v3430_v27 = vld [vmem:[#allocation4 + $0x70] sm:$0xff] }
 0xda8   :  { %v2834_v24 = vpop.permute.xlu0 %2833 }
 0xda9   :  { %v2907_v28 = vmul.f32 %v3417_v8, %v2834_v24  ;;  %v3429_v8 = vld [vmem:[#allocation4 + $0x78] sm:$0xff] }
 0xdab   :  { %v2923_v6 = vsel %vm174_vm0, %v2907_v28, 0.0 }
 0xdac   :  { %v2839_v40 = vpop.permute.xlu0 %2838  ;;  %v2924_v47 = vadd.f32 %v2923_v6, %v2922_v50 }
 0xdad   :  { %v2908_v17 = vmul.f32 %v3418_v0, %v2839_v40  ;;  %v3427_v40 = vld [vmem:[#allocation4 + $0x60] sm:$0xff] }
 0xdae   :  { %v2925_v22 = vrot.slane %v2924_v47, 4 }
 0xdaf   :  { %v2931_v55 = vsel %vm174_vm0, %v2908_v17, 0.0 }
 0xdb0   :  { %v2844_v37 = vpop.permute.xlu0 %2843  ;;  %v2926_v54 = vadd.f32 %v2925_v22, %v2924_v47 }
 0xdb1   :  { %v2909_v29 = vmul.f32 %v3415_v13, %v2844_v37 }
 0xdb3   :  { %v2932_v59 = vsel %vm174_vm0, %v2909_v29, 0.0  ;;  %v3428_v29 = vld [vmem:[#allocation4 + $0x68] sm:$0xff] }
 0xdb4   :  { %v2849_v9 = vpop.permute.xlu0 %2848  ;;  %v2933_v19 = vadd.f32 %v2932_v59, %v2931_v55 }
 0xdb5   :  { %v2910_v18 = vmul.f32 %v3420_v10, %v2849_v9  ;;  %v2904_v9 = vpop.permute.xlu1 %2903 }
 0xdb6   :  { %v2934_v34 = vrot.slane %v2933_v19, 4  ;;  %v2921_v28 = vmul.f32 %v3429_v8, %v2904_v9 }
 0xdb7   :  { %v2940_v63 = vsel %vm174_vm0, %v2910_v18, 0.0 }
 0xdb8   :  { %v2854_v58 = vpop.permute.xlu0 %2853  ;;  %v2935_v51 = vadd.f32 %v2934_v34, %v2933_v19 }
 0xdb9   :  { %v2911_v25 = vmul.f32 %v3416_v43, %v2854_v58 }
 0xdba   :  { %v2936_v58 = vrot.slane %v2935_v51, 2 }
 0xdbb   :  { %v2941_v16 = vsel %vm174_vm0, %v2911_v25, 0.0  ;;  %v2927_v25 = vrot.slane %v2926_v54, 2 }
 0xdbc   :  { %v2859_v26 = vpop.permute.xlu0 %2858  ;;  %v2942_v53 = vadd.f32 %v2941_v16, %v2940_v63 }
 0xdbd   :  { %v2912_v31 = vmul.f32 %v3422_v48, %v2859_v26  ;;  %v2928_v48 = vadd.f32 %v2927_v25, %v2926_v54 }
 0xdbe   :  { %v2943_v3 = vrot.slane %v2942_v53, 4 }
 0xdbf   :  { %v2949_v44 = vsel %vm174_vm0, %v2912_v31, 0.0  ;;  %v2929_v63 = vrot.slane %v2928_v48, 1 }
 0xdc0   :  { %v2864_v33 = vpop.permute.xlu0 %2863  ;;  %v2944_v46 = vadd.f32 %v2943_v3, %v2942_v53 }
 0xdc1   :  { %v2913_v39 = vmul.f32 %v3419_v21, %v2864_v33 }
 0xdc2   :  { %v2945_v13 = vrot.slane %v2944_v46, 2 }
 0xdc3   :  { %v2950_v30 = vsel %vm174_vm0, %v2913_v39, 0.0  ;;  %v2937_v39 = vadd.f32 %v2936_v58, %v2935_v51 }
 0xdc4   :  { %v2869_v20 = vpop.permute.xlu0 %2868  ;;  %v2951_v56 = vadd.f32 %v2950_v30, %v2949_v44  ;;  %v2946_v11 = vadd.f32 %v2945_v13, %v2944_v46 }
 0xdc5   :  { %v2914_v1 = vmul.f32 %v3423_v12, %v2869_v20  ;;  %v2938_v16 = vrot.slane %v2937_v39, 1 }
 0xdc6   :  { %v2952_v7 = vrot.slane %v2951_v56, 4  ;;  %v2947_v19 = vrot.slane %v2946_v11, 1 }
 0xdc7   :  { %v2958_v41 = vsel %vm174_vm0, %v2914_v1, 0.0  ;;  %v2986_v1 = vsel %vm174_vm0, %v2921_v28, 0.0  ;;  %v2939_v44 = vadd.f32 %v2938_v16, %v2937_v39 }
 0xdc8   :  { %v2879_v52 = vpop.permute.xlu0 %2878  ;;  %v2960_v38 = vadd.f32 %v2959_v32, %v2958_v41  ;;  %v2953_v49 = vadd.f32 %v2952_v7, %v2951_v56 }
 0xdc9   :  { %v2916_v45 = vmul.f32 %v3425_v14, %v2879_v52  ;;  %v2930_v14 = vadd.f32 %v2929_v63, %v2928_v48 }
 0xdca   :  { %v2961_v62 = vrot.slane %v2960_v38, 4  ;;  %v2954_v4 = vrot.slane %v2953_v49, 2 }
 0xdcb   :  { %v2967_v2 = vsel %vm174_vm0, %v2916_v45, 0.0 }
 0xdcc   :  { %v2884_v61 = vpop.permute.xlu0 %2883  ;;  %v2962_v24 = vadd.f32 %v2961_v62, %v2960_v38  ;;  %v2955_v31 = vadd.f32 %v2954_v4, %v2953_v49  ;;  %v2948_v38 = vadd.f32 %v2947_v19, %v2946_v11 }
 0xdcd   :  { %v2917_v57 = vmul.f32 %v3426_v15, %v2884_v61  ;;  %v3002_v15 = vsel %vm563_vm3, %v2939_v44, %v2930_v14 }
 0xdce   :  { %v2963_v0 = vrot.slane %v2962_v24, 2  ;;  %v2956_v41 = vrot.slane %v2955_v31, 1  ;;  %v3003_v7 = vsel %vm565_vm4, %v2948_v38, %v3002_v15 }
 0xdcf   :  { %v2968_v5 = vsel %vm174_vm0, %v2917_v57, 0.0 }
 0xdd0   :  { %v2969_v36 = vadd.f32 %v2968_v5, %v2967_v2  ;;  %v2889_v42 = vpop.permute.xlu0 %2888  ;;  %v2964_v60 = vadd.f32 %v2963_v0, %v2962_v24  ;;  %v2957_v45 = vadd.f32 %v2956_v41, %v2955_v31 }
 0xdd1   :  { %v2918_v37 = vmul.f32 %v3427_v40, %v2889_v42 }
 0xdd2   :  { %v2970_v35 = vrot.slane %v2969_v36, 4  ;;  %v2965_v53 = vrot.slane %v2964_v60, 1  ;;  %v3004_v5 = vsel %vm567_vm5, %v2957_v45, %v3003_v7 }
 0xdd3   :  { %v2976_v17 = vsel %vm174_vm0, %v2918_v37, 0.0 }
 0xdd4   :  { %v2971_v26 = vadd.f32 %v2970_v35, %v2969_v36  ;;  %v2894_v33 = vpop.permute.xlu0 %2893  ;;  %v2966_v3 = vadd.f32 %v2965_v53, %v2964_v60 }
 0xdd5   :  { %v2919_v43 = vmul.f32 %v3428_v29, %v2894_v33 }
 0xdd6   :  { %v2972_v10 = vrot.slane %v2971_v26, 2  ;;  %v3005_v51 = vsel %vm569_vm6, %v2966_v3, %v3004_v5 }
 0xdd7   :  { %v2977_v21 = vsel %vm174_vm0, %v2919_v43, 0.0 }
 0xdd8   :  { %v2978_v18 = vadd.f32 %v2977_v21, %v2976_v17  ;;  %v2899_v20 = vpop.permute.xlu0 %2898  ;;  %v2973_v6 = vadd.f32 %v2972_v10, %v2971_v26 }
 0xdd9   :  { %v2920_v59 = vmul.f32 %v3430_v27, %v2899_v20 }
 0xdda   :  { %v2979_v12 = vrot.slane %v2978_v18, 4  ;;  %v2974_v32 = vrot.slane %v2973_v6, 1 }
 0xddb   :  { %v2985_v23 = vsel %vm174_vm0, %v2920_v59, 0.0 }
 0xddc   :  { %v2980_v55 = vadd.f32 %v2979_v12, %v2978_v18  ;;  %v2987_v30 = vadd.f32 %v2986_v1, %v2985_v23  ;;  %v2975_v57 = vadd.f32 %v2974_v32, %v2973_v6 }
 0xdde   :  { %v2981_v52 = vrot.slane %v2980_v55, 2  ;;  %v2988_v50 = vrot.slane %v2987_v30, 4  ;;  %v3006_v42 = vsel %vm571_vm7, %v2975_v57, %v3005_v51 }
 0xde0   :  { %v2982_v47 = vadd.f32 %v2981_v52, %v2980_v55  ;;  %v2989_v56 = vadd.f32 %v2988_v50, %v2987_v30 }
 0xde2   :  { %v2983_v34 = vrot.slane %v2982_v47, 1  ;;  %v2990_v61 = vrot.slane %v2989_v56, 2 }
 0xde4   :  { %v2991_v22 = vadd.f32 %v2990_v61, %v2989_v56  ;;  %v2984_v62 = vadd.f32 %v2983_v34, %v2982_v47 }
 0xde6   :  { %v2992_v2 = vrot.slane %v2991_v22, 1  ;;  %v3007_v46 = vsel %vm573_vm8, %v2984_v62, %v3006_v42 }
 0xde8   :  { %v2993_v36 = vadd.f32 %v2992_v2, %v2991_v22 }
 0xdea   :  { %v3008_v54 = vsel %vm575_vm9, %v2993_v36, %v3007_v46 }
 0xdeb   :  { %3010 = vst.msk [vmem:[#allocation16] sm:$0xff] %vm174_vm0, %v3008_v54 }
 0xdec   :  { %3628 = shalt.err (!%p3625_p1)
}
 0xded   :  { %s3629_s25 = scalar_lea.hbm %s4899_s13, 128 }
 0xdee   :  { %p3630_p2 = scmp.ne.s32.totalorder %s4899_s13, %s3629_s25  ;;  %p3633_p3 = scmp.lt.u32.totalorder %s3629_s25, %s4899_s13 }
 0xdf0   :  { %p3635_p4 = pnand %p3633_p3, %p3630_p2 }
 0xdf2   :  { %3638 = shalt.err (!%p3635_p4)
}
 0xdf3   :  { %3022 = dma.vmem_to_hbm [thread:$0]  %s3020_s22, 128, %s4899_s13, [#allocation6]  }
 0xdf4   :  { %3649 = dma.done.wait [#allocation6], 128  }
 0xdf5   :  { %3650 = vsyncadd [#allocation6], 4294967168 }
 0xdf6   :  { %3651 = dma.done.wait [#allocation18], 128  }
 0xdf7   :  { %3652 = vsyncadd [#allocation18], 4294967168 }
 0xdf8   :  { %3039 = vsyncpa [#allocation5], 1 }
 0xdf9   :  { %3040 = vsyncpa [#allocation8], 1 }
 0xdfa   :  { %3041 = vsyncpa [#allocation11], 1 }
 0xdfb   :  { %3042 = vsyncpa [#allocation14], 1 }
 0xdfc   :  { %3043 = vsyncpa [#allocation6], 1 }
 0xdfd   :  { %3044 = vsyncpa [#allocation18], 1 }

</bundles_post_ra>
